<compile_context>
chip_gen: v6e
topology: v6e:2x2x1
jax: 0.10.0
libtpu: 0.0.40
codegen_flags: <defaults>
</compile_context>

<pallas_src>
import functools
import math

import jax
import jax.numpy as jnp
from jax.experimental import pallas as pl
from jax.experimental.pallas import tpu as pltpu

# ----------------------------- model configuration -----------------------------
NODE_TYPES = ["user", "item"]
EDGE_TYPES = [
    ("user", "rates", "item"),
    ("item", "rev_rates", "user"),
    ("user", "follows", "user"),
]
NODE_DIMS = {"user": 10, "item": 6}   # per-node-type input dims (first layer)
DIMS = [32, 32]                        # hidden dims
OUT_DIM = 16                           # final out_dim
AGGR = "sum"                           # aggr used by both SAGEConv and HeteroConv
BATCH_NORM = True
BN_EPS = 1e-5

LANE = 128                             # pad feature dims to one full vreg lane width
SUBLANE = 8                            # pad node counts to a sublane multiple
NUM_LAYERS = len(DIMS) + 1

# static grouping of edge types by destination node type (preserves EDGE_TYPES order)
DST_GROUPS = {nt: [et for et in EDGE_TYPES if et[2] == nt] for nt in NODE_TYPES}


# ----------------------------- small helpers -----------------------------
def _round_up(n, m):
    return (n + m - 1) // m * m


def _pad2(x, rows, cols):
    return jnp.pad(x, ((0, rows - x.shape[0]), (0, cols - x.shape[1])))


def _pad1(x, n):
    return jnp.pad(x, (0, n - x.shape[0]))


# ----------------------------- fused Pallas kernel -----------------------------
def _batch_norm(s, gamma, beta, mask, n_real):
    # Training-mode BatchNorm (biased variance); statistics over the real rows only.
    sm = s * mask
    inv_n = 1.0 / float(n_real)
    mean = jnp.sum(sm, axis=0, keepdims=True) * inv_n
    var = jnp.sum(sm * sm, axis=0, keepdims=True) * inv_n - mean * mean
    return gamma * (s - mean) * jax.lax.rsqrt(var + BN_EPS) + beta


def _fused_gnn_kernel(num_real, *refs):
    """Entire HeteroGNN forward pass (all layers) with everything VMEM/vreg-resident.

    Ref layout (inputs then outputs):
      x per node type           [N_pad, LANE]
      adj per edge type         [N_dst_pad, N_src_pad]
      W per node type           [L, (E_dst+1)*LANE, LANE]   (stacked [W_l ... ; sum W_r])
      b per node type           [L, 1, LANE]                (summed neighbor-linear biases)
      gamma per node type       [L, 1, LANE]
      beta per node type        [L, 1, LANE]
      out per node type         [N_pad, LANE]
    """
    nt_n, et_n = len(NODE_TYPES), len(EDGE_TYPES)
    it = iter(refs)
    x_refs = [next(it) for _ in range(nt_n)]
    a_refs = [next(it) for _ in range(et_n)]
    w_refs = [next(it) for _ in range(nt_n)]
    b_refs = [next(it) for _ in range(nt_n)]
    g_refs = [next(it) for _ in range(nt_n)]
    be_refs = [next(it) for _ in range(nt_n)]
    o_refs = [next(it) for _ in range(nt_n)]

    # Load features / adjacency once; they stay resident for all layers.
    x = {nt: x_refs[i][...] for i, nt in enumerate(NODE_TYPES)}
    adj = {et: a_refs[i][...] for i, et in enumerate(EDGE_TYPES)}

    # Row-validity masks: padded rows pick up the broadcast bias; exclude them from BN stats.
    masks = {}
    for i, nt in enumerate(NODE_TYPES):
        rows = x_refs[i].shape[0]
        rid = jax.lax.broadcasted_iota(jnp.int32, (rows, LANE), 0)
        masks[nt] = (rid < num_real[nt]).astype(jnp.float32)

    for layer in range(NUM_LAYERS):
        if layer > 0:
            # NodeApplied(ReLU) between HeteroGNNLayers
            x = {nt: jnp.maximum(x[nt], 0.0) for nt in NODE_TYPES}
        new_x = {}
        for i, dst in enumerate(NODE_TYPES):
            # One fused matmul per destination node type:
            #   concat([A_e @ x_src_e for e targeting dst] + [x_dst]) @ stacked_W + summed_bias
            parts = [jnp.dot(adj[et], x[et[0]], preferred_element_type=jnp.float32)
                     for et in DST_GROUPS[dst]]
            parts.append(x[dst])
            cat = jnp.concatenate(parts, axis=1)
            s = jnp.dot(cat, w_refs[i][layer],
                        preferred_element_type=jnp.float32) + b_refs[i][layer]
            if BATCH_NORM:
                s = _batch_norm(s, g_refs[i][layer], be_refs[i][layer],
                                masks[dst], num_real[dst])
            new_x[dst] = s * masks[dst]      # keep padded rows exactly zero
        x = new_x

    for i, nt in enumerate(NODE_TYPES):
        o_refs[i][...] = x[nt]


# ----------------------------- parameter init (deterministic) -----------------------------
def _init_linear(key, d_in, d_out, with_bias):
    k_w, k_b = jax.random.split(key)
    bound = 1.0 / math.sqrt(d_in)
    w = jax.random.uniform(k_w, (d_in, d_out), jnp.float32, -bound, bound)
    b = (jax.random.uniform(k_b, (d_out,), jnp.float32, -bound, bound)
         if with_bias else None)
    return w, b


def init_hetero_gnn_params(key):
    the_dims = DIMS + [OUT_DIM]
    layer_in_dims = [NODE_DIMS] + [{nt: d for nt in NODE_TYPES} for d in the_dims[:-1]]
    layers = []
    for li, out_dim in enumerate(the_dims):
        in_dims = layer_in_dims[li]
        convs = {}
        for et in EDGE_TYPES:
            key, k1, k2 = jax.random.split(key, 3)
            w_l, b_l = _init_linear(k1, in_dims[et[0]], out_dim, True)   # neighbor linear (bias)
            w_r, _ = _init_linear(k2, in_dims[et[2]], out_dim, False)    # root linear (no bias)
            convs[et] = {"w_l": w_l, "b_l": b_l, "w_r": w_r}
        bn = None
        if BATCH_NORM:
            bn = {nt: {"gamma": jnp.ones((out_dim,), jnp.float32),
                       "beta": jnp.zeros((out_dim,), jnp.float32)} for nt in NODE_TYPES}
        layers.append({"convs": convs, "bn": bn})
    return layers


# ----------------------------- wrapper: pack, pad, call kernel -----------------------------
def _pack_kernel_params(params):
    """Pad & stack per-layer weights into lane-dense blocks, grouped per destination type."""
    w_stk, b_stk, g_stk, be_stk = {}, {}, {}, {}
    for nt in NODE_TYPES:
        w_layers, b_layers, g_layers, be_layers = [], [], [], []
        for layer in params:
            blocks, bias, wr_sum = [], jnp.zeros((LANE,), jnp.float32), None
            for et in DST_GROUPS[nt]:
                p = layer["convs"][et]
                blocks.append(_pad2(p["w_l"], LANE, LANE))     # neighbor linear
                bias = bias + _pad1(p["b_l"], LANE)
                wr = _pad2(p["w_r"], LANE, LANE)               # root linear (all act on x_dst)
                wr_sum = wr if wr_sum is None else wr_sum + wr
            blocks.append(wr_sum)
            w_layers.append(jnp.concatenate(blocks, axis=0))   # [(E_dst+1)*LANE, LANE]
            b_layers.append(bias.reshape(1, LANE))
            if BATCH_NORM:
                g_layers.append(_pad1(layer["bn"][nt]["gamma"], LANE).reshape(1, LANE))
                be_layers.append(_pad1(layer["bn"][nt]["beta"], LANE).reshape(1, LANE))
            else:
                g_layers.append(jnp.ones((1, LANE), jnp.float32))
                be_layers.append(jnp.zeros((1, LANE), jnp.float32))
        w_stk[nt] = jnp.stack(w_layers, 0)
        b_stk[nt] = jnp.stack(b_layers, 0)
        g_stk[nt] = jnp.stack(g_layers, 0)
        be_stk[nt] = jnp.stack(be_layers, 0)
    return w_stk, b_stk, g_stk, be_stk


def hetero_gnn_forward(params, x_dict, adj_dict):
    num_real = {nt: int(x_dict[nt].shape[0]) for nt in NODE_TYPES}
    npad = {nt: _round_up(num_real[nt], SUBLANE) for nt in NODE_TYPES}

    x_p = [_pad2(x_dict[nt], npad[nt], LANE) for nt in NODE_TYPES]
    a_p = [_pad2(adj_dict[et], npad[et[2]], npad[et[0]]) for et in EDGE_TYPES]
    w_stk, b_stk, g_stk, be_stk = _pack_kernel_params(params)

    args = (x_p + a_p
            + [w_stk[nt] for nt in NODE_TYPES]
            + [b_stk[nt] for nt in NODE_TYPES]
            + [g_stk[nt] for nt in NODE_TYPES]
            + [be_stk[nt] for nt in NODE_TYPES])

    out_shapes = tuple(jax.ShapeDtypeStruct((npad[nt], LANE), jnp.float32)
                       for nt in NODE_TYPES)

    outs = pl.pallas_call(
        functools.partial(_fused_gnn_kernel, num_real),
        out_shape=out_shapes,
        compiler_params=pltpu.CompilerParams(vmem_limit_bytes=32 * 1024 * 1024),
    )(*args)

    return {nt: outs[i][:num_real[nt], :OUT_DIM] for i, nt in enumerate(NODE_TYPES)}


# ----------------------------- pure-JAX reference (for verification) -----------------------------
def reference_forward(params, x_dict, adj_dict):
    x = x_dict
    for li, layer in enumerate(params):
        if li > 0:
            x = {nt: jnp.maximum(x[nt], 0.0) for nt in NODE_TYPES}
        per_dst = {nt: [] for nt in NODE_TYPES}
        for et in EDGE_TYPES:
            src, _, dst = et
            p = layer["convs"][et]
            agg = adj_dict[et] @ x[src]
            per_dst[dst].append(agg @ p["w_l"] + p["b_l"] + x[dst] @ p["w_r"])
        new_x = {}
        for nt in NODE_TYPES:
            s = jnp.sum(jnp.stack(per_dst[nt], 0), 0)
            if BATCH_NORM:
                mean = jnp.mean(s, 0, keepdims=True)
                var = jnp.mean((s - mean) ** 2, 0, keepdims=True)
                s = (layer["bn"][nt]["gamma"] * (s - mean) / jnp.sqrt(var + BN_EPS)
                     + layer["bn"][nt]["beta"])
            new_x[nt] = s
        x = new_x
    return x


# ----------------------------- glue: dense aggregation matrix from edge_index -----------------------------
def build_adj(edge_index, n_src, n_dst):
    src, dst = edge_index[0], edge_index[1]
    a = jnp.zeros((n_dst, n_src), jnp.float32)
    return a.at[dst, src].add(1.0)   # edge-count matrix; A @ X_src == sum-aggregation


# ----------------------------- main -----------------------------
if __name__ == "__main__":
    key = jax.random.PRNGKey(0)

    num_nodes = {"user": 12, "item": 16}
    num_edges = 40

    # node features
    x_dict = {}
    for nt in NODE_TYPES:
        key, k = jax.random.split(key)
        x_dict[nt] = jax.random.normal(k, (num_nodes[nt], NODE_DIMS[nt]), jnp.float32)

    # edge indices (COO: row 0 = src node ids, row 1 = dst node ids)
    edge_index_dict = {}
    for et in EDGE_TYPES:
        src_t, _, dst_t = et
        key, k1, k2 = jax.random.split(key, 3)
        src = jax.random.randint(k1, (num_edges,), 0, num_nodes[src_t])
        dst = jax.random.randint(k2, (num_edges,), 0, num_nodes[dst_t])
        edge_index_dict[et] = jnp.stack([src, dst], axis=0)

    adj_dict = {et: build_adj(edge_index_dict[et], num_nodes[et[0]], num_nodes[et[2]])
                for et in EDGE_TYPES}

    params = init_hetero_gnn_params(jax.random.PRNGKey(42))

    out = hetero_gnn_forward(params, x_dict, adj_dict)
    out = jax.block_until_ready(out)

    ref = reference_forward(params, x_dict, adj_dict)
    for nt in NODE_TYPES:
        assert out[nt].shape == (num_nodes[nt], OUT_DIM)
        assert jnp.allclose(out[nt], ref[nt], rtol=1e-3, atol=1e-3), f"mismatch for {nt}"

    print("KERNEL_OK")
</pallas_src>

<mosaic_0001>
module attributes {stable_mosaic.version = 11 : i64} {
  func.func @_fused_gnn_kernel(%arg0: memref<16x128xf32, #tpu.memory_space<vmem>>, %arg1: memref<16x128xf32, #tpu.memory_space<vmem>>, %arg2: memref<16x16xf32, #tpu.memory_space<vmem>>, %arg3: memref<16x16xf32, #tpu.memory_space<vmem>>, %arg4: memref<16x16xf32, #tpu.memory_space<vmem>>, %arg5: memref<3x384x128xf32, #tpu.memory_space<vmem>>, %arg6: memref<3x256x128xf32, #tpu.memory_space<vmem>>, %arg7: memref<3x1x128xf32, #tpu.memory_space<vmem>>, %arg8: memref<3x1x128xf32, #tpu.memory_space<vmem>>, %arg9: memref<3x1x128xf32, #tpu.memory_space<vmem>>, %arg10: memref<3x1x128xf32, #tpu.memory_space<vmem>>, %arg11: memref<3x1x128xf32, #tpu.memory_space<vmem>>, %arg12: memref<3x1x128xf32, #tpu.memory_space<vmem>>, %arg13: memref<16x128xf32, #tpu.memory_space<vmem>>, %arg14: memref<16x128xf32, #tpu.memory_space<vmem>>) attributes {dimension_semantics = [], scalar_prefetch = 0 : i64, scratch_operands = 0 : i64, tpu.core_type = #tpu.core_type<tc>} {
    %c0 = arith.constant 0 : index
    %c0_0 = arith.constant 0 : index
    %0 = vector.load %arg0[%c0, %c0_0] : memref<16x128xf32, #tpu.memory_space<vmem>>, vector<16x128xf32>
    %c0_1 = arith.constant 0 : index
    %c0_2 = arith.constant 0 : index
    %1 = vector.load %arg1[%c0_1, %c0_2] : memref<16x128xf32, #tpu.memory_space<vmem>>, vector<16x128xf32>
    %c0_3 = arith.constant 0 : index
    %c0_4 = arith.constant 0 : index
    %2 = vector.load %arg2[%c0_3, %c0_4] : memref<16x16xf32, #tpu.memory_space<vmem>>, vector<16x16xf32>
    %c0_5 = arith.constant 0 : index
    %c0_6 = arith.constant 0 : index
    %3 = vector.load %arg3[%c0_5, %c0_6] : memref<16x16xf32, #tpu.memory_space<vmem>>, vector<16x16xf32>
    %c0_7 = arith.constant 0 : index
    %c0_8 = arith.constant 0 : index
    %4 = vector.load %arg4[%c0_7, %c0_8] : memref<16x16xf32, #tpu.memory_space<vmem>>, vector<16x16xf32>
    %5 = tpu.iota {dimensions = array<i32: 0>} : vector<16x128xi32>
    %c12_i32 = arith.constant 12 : i32
    %6 = vector.broadcast %c12_i32 : i32 to vector<16x128xi32>
    %7 = arith.cmpi slt, %5, %6 : vector<16x128xi32>
    %8 = arith.extui %7 : vector<16x128xi1> to vector<16x128xi32>
    %9 = arith.sitofp %8 : vector<16x128xi32> to vector<16x128xf32>
    %10 = tpu.iota {dimensions = array<i32: 0>} : vector<16x128xi32>
    %c16_i32 = arith.constant 16 : i32
    %11 = vector.broadcast %c16_i32 : i32 to vector<16x128xi32>
    %12 = arith.cmpi slt, %10, %11 : vector<16x128xi32>
    %13 = arith.extui %12 : vector<16x128xi1> to vector<16x128xi32>
    %14 = arith.sitofp %13 : vector<16x128xi32> to vector<16x128xf32>
    %cst = arith.constant dense<0.000000e+00> : vector<16x128xf32>
    %15 = tpu.matmul %3, %1, %cst {dimension_numbers = #tpu.dot_dimension_numbers<[1], [0], [0], [1], [0, 0, 1, 1], [], []>} : vector<16x16xf32>, vector<16x128xf32>, vector<16x128xf32> -> vector<16x128xf32>
    %cst_9 = arith.constant dense<0.000000e+00> : vector<16x128xf32>
    %16 = tpu.matmul %4, %0, %cst_9 {dimension_numbers = #tpu.dot_dimension_numbers<[1], [0], [0], [1], [0, 0, 1, 1], [], []>} : vector<16x16xf32>, vector<16x128xf32>, vector<16x128xf32> -> vector<16x128xf32>
    %17 = tpu.concatenate %15, %16, %0 in 1 : vector<16x128xf32>, vector<16x128xf32>, vector<16x128xf32> -> vector<16x384xf32>
    %c0_10 = arith.constant 0 : index
    %c0_11 = arith.constant 0 : index
    %c0_12 = arith.constant 0 : index
    %18 = vector.load %arg5[%c0_10, %c0_11, %c0_12] : memref<3x384x128xf32, #tpu.memory_space<vmem>>, vector<1x384x128xf32>
    %19 = vector.shape_cast %18 : vector<1x384x128xf32> to vector<384x128xf32>
    %cst_13 = arith.constant dense<0.000000e+00> : vector<16x128xf32>
    %20 = tpu.matmul %17, %19, %cst_13 {dimension_numbers = #tpu.dot_dimension_numbers<[1], [0], [0], [1], [0, 0, 1, 1], [], []>} : vector<16x384xf32>, vector<384x128xf32>, vector<16x128xf32> -> vector<16x128xf32>
    %c0_14 = arith.constant 0 : index
    %c0_15 = arith.constant 0 : index
    %c0_16 = arith.constant 0 : index
    %21 = vector.load %arg7[%c0_14, %c0_15, %c0_16] : memref<3x1x128xf32, #tpu.memory_space<vmem>>, vector<1x1x128xf32>
    %22 = vector.shape_cast %21 : vector<1x1x128xf32> to vector<1x128xf32>
    %23 = vector.broadcast %22 : vector<1x128xf32> to vector<16x128xf32>
    %24 = arith.addf %20, %23 : vector<16x128xf32>
    %c0_17 = arith.constant 0 : index
    %c0_18 = arith.constant 0 : index
    %c0_19 = arith.constant 0 : index
    %25 = vector.load %arg9[%c0_17, %c0_18, %c0_19] : memref<3x1x128xf32, #tpu.memory_space<vmem>>, vector<1x1x128xf32>
    %26 = vector.shape_cast %25 : vector<1x1x128xf32> to vector<1x128xf32>
    %c0_20 = arith.constant 0 : index
    %c0_21 = arith.constant 0 : index
    %c0_22 = arith.constant 0 : index
    %27 = vector.load %arg11[%c0_20, %c0_21, %c0_22] : memref<3x1x128xf32, #tpu.memory_space<vmem>>, vector<1x1x128xf32>
    %28 = vector.shape_cast %27 : vector<1x1x128xf32> to vector<1x128xf32>
    %29 = arith.mulf %24, %9 : vector<16x128xf32>
    %cst_23 = arith.constant dense<0.000000e+00> : vector<128xf32>
    %30 = vector.multi_reduction <add>, %29, %cst_23 [0] : vector<16x128xf32> to vector<128xf32>
    %31 = vector.shape_cast %30 : vector<128xf32> to vector<1x128xf32>
    %cst_24 = arith.constant 0.0833333358 : f32
    %32 = vector.broadcast %cst_24 : f32 to vector<1x128xf32>
    %33 = arith.mulf %31, %32 : vector<1x128xf32>
    %34 = arith.mulf %29, %29 : vector<16x128xf32>
    %cst_25 = arith.constant dense<0.000000e+00> : vector<128xf32>
    %35 = vector.multi_reduction <add>, %34, %cst_25 [0] : vector<16x128xf32> to vector<128xf32>
    %36 = vector.shape_cast %35 : vector<128xf32> to vector<1x128xf32>
    %cst_26 = arith.constant 0.0833333358 : f32
    %37 = vector.broadcast %cst_26 : f32 to vector<1x128xf32>
    %38 = arith.mulf %36, %37 : vector<1x128xf32>
    %39 = arith.mulf %33, %33 : vector<1x128xf32>
    %40 = arith.subf %38, %39 : vector<1x128xf32>
    %41 = vector.broadcast %33 : vector<1x128xf32> to vector<16x128xf32>
    %42 = arith.subf %24, %41 : vector<16x128xf32>
    %43 = vector.broadcast %26 : vector<1x128xf32> to vector<16x128xf32>
    %44 = arith.mulf %43, %42 : vector<16x128xf32>
    %cst_27 = arith.constant 9.99999974E-6 : f32
    %45 = vector.broadcast %cst_27 : f32 to vector<1x128xf32>
    %46 = arith.addf %40, %45 : vector<1x128xf32>
    %47 = math.rsqrt %46 : vector<1x128xf32>
    %48 = vector.broadcast %47 : vector<1x128xf32> to vector<16x128xf32>
    %49 = arith.mulf %44, %48 : vector<16x128xf32>
    %50 = vector.broadcast %28 : vector<1x128xf32> to vector<16x128xf32>
    %51 = arith.addf %49, %50 : vector<16x128xf32>
    %52 = arith.mulf %51, %9 : vector<16x128xf32>
    %cst_28 = arith.constant dense<0.000000e+00> : vector<16x128xf32>
    %53 = tpu.matmul %2, %0, %cst_28 {dimension_numbers = #tpu.dot_dimension_numbers<[1], [0], [0], [1], [0, 0, 1, 1], [], []>} : vector<16x16xf32>, vector<16x128xf32>, vector<16x128xf32> -> vector<16x128xf32>
    %54 = tpu.concatenate %53, %1 in 1 : vector<16x128xf32>, vector<16x128xf32> -> vector<16x256xf32>
    %c0_29 = arith.constant 0 : index
    %c0_30 = arith.constant 0 : index
    %c0_31 = arith.constant 0 : index
    %55 = vector.load %arg6[%c0_29, %c0_30, %c0_31] : memref<3x256x128xf32, #tpu.memory_space<vmem>>, vector<1x256x128xf32>
    %56 = vector.shape_cast %55 : vector<1x256x128xf32> to vector<256x128xf32>
    %cst_32 = arith.constant dense<0.000000e+00> : vector<16x128xf32>
    %57 = tpu.matmul %54, %56, %cst_32 {dimension_numbers = #tpu.dot_dimension_numbers<[1], [0], [0], [1], [0, 0, 1, 1], [], []>} : vector<16x256xf32>, vector<256x128xf32>, vector<16x128xf32> -> vector<16x128xf32>
    %c0_33 = arith.constant 0 : index
    %c0_34 = arith.constant 0 : index
    %c0_35 = arith.constant 0 : index
    %58 = vector.load %arg8[%c0_33, %c0_34, %c0_35] : memref<3x1x128xf32, #tpu.memory_space<vmem>>, vector<1x1x128xf32>
    %59 = vector.shape_cast %58 : vector<1x1x128xf32> to vector<1x128xf32>
    %60 = vector.broadcast %59 : vector<1x128xf32> to vector<16x128xf32>
    %61 = arith.addf %57, %60 : vector<16x128xf32>
    %c0_36 = arith.constant 0 : index
    %c0_37 = arith.constant 0 : index
    %c0_38 = arith.constant 0 : index
    %62 = vector.load %arg10[%c0_36, %c0_37, %c0_38] : memref<3x1x128xf32, #tpu.memory_space<vmem>>, vector<1x1x128xf32>
    %63 = vector.shape_cast %62 : vector<1x1x128xf32> to vector<1x128xf32>
    %c0_39 = arith.constant 0 : index
    %c0_40 = arith.constant 0 : index
    %c0_41 = arith.constant 0 : index
    %64 = vector.load %arg12[%c0_39, %c0_40, %c0_41] : memref<3x1x128xf32, #tpu.memory_space<vmem>>, vector<1x1x128xf32>
    %65 = vector.shape_cast %64 : vector<1x1x128xf32> to vector<1x128xf32>
    %66 = arith.mulf %61, %14 : vector<16x128xf32>
    %cst_42 = arith.constant dense<0.000000e+00> : vector<128xf32>
    %67 = vector.multi_reduction <add>, %66, %cst_42 [0] : vector<16x128xf32> to vector<128xf32>
    %68 = vector.shape_cast %67 : vector<128xf32> to vector<1x128xf32>
    %cst_43 = arith.constant 6.250000e-02 : f32
    %69 = vector.broadcast %cst_43 : f32 to vector<1x128xf32>
    %70 = arith.mulf %68, %69 : vector<1x128xf32>
    %71 = arith.mulf %66, %66 : vector<16x128xf32>
    %cst_44 = arith.constant dense<0.000000e+00> : vector<128xf32>
    %72 = vector.multi_reduction <add>, %71, %cst_44 [0] : vector<16x128xf32> to vector<128xf32>
    %73 = vector.shape_cast %72 : vector<128xf32> to vector<1x128xf32>
    %cst_45 = arith.constant 6.250000e-02 : f32
    %74 = vector.broadcast %cst_45 : f32 to vector<1x128xf32>
    %75 = arith.mulf %73, %74 : vector<1x128xf32>
    %76 = arith.mulf %70, %70 : vector<1x128xf32>
    %77 = arith.subf %75, %76 : vector<1x128xf32>
    %78 = vector.broadcast %70 : vector<1x128xf32> to vector<16x128xf32>
    %79 = arith.subf %61, %78 : vector<16x128xf32>
    %80 = vector.broadcast %63 : vector<1x128xf32> to vector<16x128xf32>
    %81 = arith.mulf %80, %79 : vector<16x128xf32>
    %cst_46 = arith.constant 9.99999974E-6 : f32
    %82 = vector.broadcast %cst_46 : f32 to vector<1x128xf32>
    %83 = arith.addf %77, %82 : vector<1x128xf32>
    %84 = math.rsqrt %83 : vector<1x128xf32>
    %85 = vector.broadcast %84 : vector<1x128xf32> to vector<16x128xf32>
    %86 = arith.mulf %81, %85 : vector<16x128xf32>
    %87 = vector.broadcast %65 : vector<1x128xf32> to vector<16x128xf32>
    %88 = arith.addf %86, %87 : vector<16x128xf32>
    %89 = arith.mulf %88, %14 : vector<16x128xf32>
    %cst_47 = arith.constant 0.000000e+00 : f32
    %90 = vector.broadcast %cst_47 : f32 to vector<16x128xf32>
    %91 = arith.maximumf %52, %90 : vector<16x128xf32>
    %cst_48 = arith.constant 0.000000e+00 : f32
    %92 = vector.broadcast %cst_48 : f32 to vector<16x128xf32>
    %93 = arith.maximumf %89, %92 : vector<16x128xf32>
    %cst_49 = arith.constant dense<0.000000e+00> : vector<16x128xf32>
    %94 = tpu.matmul %3, %93, %cst_49 {dimension_numbers = #tpu.dot_dimension_numbers<[1], [0], [0], [1], [0, 0, 1, 1], [], []>} : vector<16x16xf32>, vector<16x128xf32>, vector<16x128xf32> -> vector<16x128xf32>
    %cst_50 = arith.constant dense<0.000000e+00> : vector<16x128xf32>
    %95 = tpu.matmul %4, %91, %cst_50 {dimension_numbers = #tpu.dot_dimension_numbers<[1], [0], [0], [1], [0, 0, 1, 1], [], []>} : vector<16x16xf32>, vector<16x128xf32>, vector<16x128xf32> -> vector<16x128xf32>
    %96 = tpu.concatenate %94, %95, %91 in 1 : vector<16x128xf32>, vector<16x128xf32>, vector<16x128xf32> -> vector<16x384xf32>
    %c1 = arith.constant 1 : index
    %c0_51 = arith.constant 0 : index
    %c0_52 = arith.constant 0 : index
    %97 = vector.load %arg5[%c1, %c0_51, %c0_52] : memref<3x384x128xf32, #tpu.memory_space<vmem>>, vector<1x384x128xf32>
    %98 = vector.shape_cast %97 : vector<1x384x128xf32> to vector<384x128xf32>
    %cst_53 = arith.constant dense<0.000000e+00> : vector<16x128xf32>
    %99 = tpu.matmul %96, %98, %cst_53 {dimension_numbers = #tpu.dot_dimension_numbers<[1], [0], [0], [1], [0, 0, 1, 1], [], []>} : vector<16x384xf32>, vector<384x128xf32>, vector<16x128xf32> -> vector<16x128xf32>
    %c1_54 = arith.constant 1 : index
    %c0_55 = arith.constant 0 : index
    %c0_56 = arith.constant 0 : index
    %100 = vector.load %arg7[%c1_54, %c0_55, %c0_56] : memref<3x1x128xf32, #tpu.memory_space<vmem>>, vector<1x1x128xf32>
    %101 = vector.shape_cast %100 : vector<1x1x128xf32> to vector<1x128xf32>
    %102 = vector.broadcast %101 : vector<1x128xf32> to vector<16x128xf32>
    %103 = arith.addf %99, %102 : vector<16x128xf32>
    %c1_57 = arith.constant 1 : index
    %c0_58 = arith.constant 0 : index
    %c0_59 = arith.constant 0 : index
    %104 = vector.load %arg9[%c1_57, %c0_58, %c0_59] : memref<3x1x128xf32, #tpu.memory_space<vmem>>, vector<1x1x128xf32>
    %105 = vector.shape_cast %104 : vector<1x1x128xf32> to vector<1x128xf32>
    %c1_60 = arith.constant 1 : index
    %c0_61 = arith.constant 0 : index
    %c0_62 = arith.constant 0 : index
    %106 = vector.load %arg11[%c1_60, %c0_61, %c0_62] : memref<3x1x128xf32, #tpu.memory_space<vmem>>, vector<1x1x128xf32>
    %107 = vector.shape_cast %106 : vector<1x1x128xf32> to vector<1x128xf32>
    %108 = arith.mulf %103, %9 : vector<16x128xf32>
    %cst_63 = arith.constant dense<0.000000e+00> : vector<128xf32>
    %109 = vector.multi_reduction <add>, %108, %cst_63 [0] : vector<16x128xf32> to vector<128xf32>
    %110 = vector.shape_cast %109 : vector<128xf32> to vector<1x128xf32>
    %cst_64 = arith.constant 0.0833333358 : f32
    %111 = vector.broadcast %cst_64 : f32 to vector<1x128xf32>
    %112 = arith.mulf %110, %111 : vector<1x128xf32>
    %113 = arith.mulf %108, %108 : vector<16x128xf32>
    %cst_65 = arith.constant dense<0.000000e+00> : vector<128xf32>
    %114 = vector.multi_reduction <add>, %113, %cst_65 [0] : vector<16x128xf32> to vector<128xf32>
    %115 = vector.shape_cast %114 : vector<128xf32> to vector<1x128xf32>
    %cst_66 = arith.constant 0.0833333358 : f32
    %116 = vector.broadcast %cst_66 : f32 to vector<1x128xf32>
    %117 = arith.mulf %115, %116 : vector<1x128xf32>
    %118 = arith.mulf %112, %112 : vector<1x128xf32>
    %119 = arith.subf %117, %118 : vector<1x128xf32>
    %120 = vector.broadcast %112 : vector<1x128xf32> to vector<16x128xf32>
    %121 = arith.subf %103, %120 : vector<16x128xf32>
    %122 = vector.broadcast %105 : vector<1x128xf32> to vector<16x128xf32>
    %123 = arith.mulf %122, %121 : vector<16x128xf32>
    %cst_67 = arith.constant 9.99999974E-6 : f32
    %124 = vector.broadcast %cst_67 : f32 to vector<1x128xf32>
    %125 = arith.addf %119, %124 : vector<1x128xf32>
    %126 = math.rsqrt %125 : vector<1x128xf32>
    %127 = vector.broadcast %126 : vector<1x128xf32> to vector<16x128xf32>
    %128 = arith.mulf %123, %127 : vector<16x128xf32>
    %129 = vector.broadcast %107 : vector<1x128xf32> to vector<16x128xf32>
    %130 = arith.addf %128, %129 : vector<16x128xf32>
    %131 = arith.mulf %130, %9 : vector<16x128xf32>
    %cst_68 = arith.constant dense<0.000000e+00> : vector<16x128xf32>
    %132 = tpu.matmul %2, %91, %cst_68 {dimension_numbers = #tpu.dot_dimension_numbers<[1], [0], [0], [1], [0, 0, 1, 1], [], []>} : vector<16x16xf32>, vector<16x128xf32>, vector<16x128xf32> -> vector<16x128xf32>
    %133 = tpu.concatenate %132, %93 in 1 : vector<16x128xf32>, vector<16x128xf32> -> vector<16x256xf32>
    %c1_69 = arith.constant 1 : index
    %c0_70 = arith.constant 0 : index
    %c0_71 = arith.constant 0 : index
    %134 = vector.load %arg6[%c1_69, %c0_70, %c0_71] : memref<3x256x128xf32, #tpu.memory_space<vmem>>, vector<1x256x128xf32>
    %135 = vector.shape_cast %134 : vector<1x256x128xf32> to vector<256x128xf32>
    %cst_72 = arith.constant dense<0.000000e+00> : vector<16x128xf32>
    %136 = tpu.matmul %133, %135, %cst_72 {dimension_numbers = #tpu.dot_dimension_numbers<[1], [0], [0], [1], [0, 0, 1, 1], [], []>} : vector<16x256xf32>, vector<256x128xf32>, vector<16x128xf32> -> vector<16x128xf32>
    %c1_73 = arith.constant 1 : index
    %c0_74 = arith.constant 0 : index
    %c0_75 = arith.constant 0 : index
    %137 = vector.load %arg8[%c1_73, %c0_74, %c0_75] : memref<3x1x128xf32, #tpu.memory_space<vmem>>, vector<1x1x128xf32>
    %138 = vector.shape_cast %137 : vector<1x1x128xf32> to vector<1x128xf32>
    %139 = vector.broadcast %138 : vector<1x128xf32> to vector<16x128xf32>
    %140 = arith.addf %136, %139 : vector<16x128xf32>
    %c1_76 = arith.constant 1 : index
    %c0_77 = arith.constant 0 : index
    %c0_78 = arith.constant 0 : index
    %141 = vector.load %arg10[%c1_76, %c0_77, %c0_78] : memref<3x1x128xf32, #tpu.memory_space<vmem>>, vector<1x1x128xf32>
    %142 = vector.shape_cast %141 : vector<1x1x128xf32> to vector<1x128xf32>
    %c1_79 = arith.constant 1 : index
    %c0_80 = arith.constant 0 : index
    %c0_81 = arith.constant 0 : index
    %143 = vector.load %arg12[%c1_79, %c0_80, %c0_81] : memref<3x1x128xf32, #tpu.memory_space<vmem>>, vector<1x1x128xf32>
    %144 = vector.shape_cast %143 : vector<1x1x128xf32> to vector<1x128xf32>
    %145 = arith.mulf %140, %14 : vector<16x128xf32>
    %cst_82 = arith.constant dense<0.000000e+00> : vector<128xf32>
    %146 = vector.multi_reduction <add>, %145, %cst_82 [0] : vector<16x128xf32> to vector<128xf32>
    %147 = vector.shape_cast %146 : vector<128xf32> to vector<1x128xf32>
    %cst_83 = arith.constant 6.250000e-02 : f32
    %148 = vector.broadcast %cst_83 : f32 to vector<1x128xf32>
    %149 = arith.mulf %147, %148 : vector<1x128xf32>
    %150 = arith.mulf %145, %145 : vector<16x128xf32>
    %cst_84 = arith.constant dense<0.000000e+00> : vector<128xf32>
    %151 = vector.multi_reduction <add>, %150, %cst_84 [0] : vector<16x128xf32> to vector<128xf32>
    %152 = vector.shape_cast %151 : vector<128xf32> to vector<1x128xf32>
    %cst_85 = arith.constant 6.250000e-02 : f32
    %153 = vector.broadcast %cst_85 : f32 to vector<1x128xf32>
    %154 = arith.mulf %152, %153 : vector<1x128xf32>
    %155 = arith.mulf %149, %149 : vector<1x128xf32>
    %156 = arith.subf %154, %155 : vector<1x128xf32>
    %157 = vector.broadcast %149 : vector<1x128xf32> to vector<16x128xf32>
    %158 = arith.subf %140, %157 : vector<16x128xf32>
    %159 = vector.broadcast %142 : vector<1x128xf32> to vector<16x128xf32>
    %160 = arith.mulf %159, %158 : vector<16x128xf32>
    %cst_86 = arith.constant 9.99999974E-6 : f32
    %161 = vector.broadcast %cst_86 : f32 to vector<1x128xf32>
    %162 = arith.addf %156, %161 : vector<1x128xf32>
    %163 = math.rsqrt %162 : vector<1x128xf32>
    %164 = vector.broadcast %163 : vector<1x128xf32> to vector<16x128xf32>
    %165 = arith.mulf %160, %164 : vector<16x128xf32>
    %166 = vector.broadcast %144 : vector<1x128xf32> to vector<16x128xf32>
    %167 = arith.addf %165, %166 : vector<16x128xf32>
    %168 = arith.mulf %167, %14 : vector<16x128xf32>
    %cst_87 = arith.constant 0.000000e+00 : f32
    %169 = vector.broadcast %cst_87 : f32 to vector<16x128xf32>
    %170 = arith.maximumf %131, %169 : vector<16x128xf32>
    %cst_88 = arith.constant 0.000000e+00 : f32
    %171 = vector.broadcast %cst_88 : f32 to vector<16x128xf32>
    %172 = arith.maximumf %168, %171 : vector<16x128xf32>
    %cst_89 = arith.constant dense<0.000000e+00> : vector<16x128xf32>
    %173 = tpu.matmul %3, %172, %cst_89 {dimension_numbers = #tpu.dot_dimension_numbers<[1], [0], [0], [1], [0, 0, 1, 1], [], []>} : vector<16x16xf32>, vector<16x128xf32>, vector<16x128xf32> -> vector<16x128xf32>
    %cst_90 = arith.constant dense<0.000000e+00> : vector<16x128xf32>
    %174 = tpu.matmul %4, %170, %cst_90 {dimension_numbers = #tpu.dot_dimension_numbers<[1], [0], [0], [1], [0, 0, 1, 1], [], []>} : vector<16x16xf32>, vector<16x128xf32>, vector<16x128xf32> -> vector<16x128xf32>
    %175 = tpu.concatenate %173, %174, %170 in 1 : vector<16x128xf32>, vector<16x128xf32>, vector<16x128xf32> -> vector<16x384xf32>
    %c2 = arith.constant 2 : index
    %c0_91 = arith.constant 0 : index
    %c0_92 = arith.constant 0 : index
    %176 = vector.load %arg5[%c2, %c0_91, %c0_92] : memref<3x384x128xf32, #tpu.memory_space<vmem>>, vector<1x384x128xf32>
    %177 = vector.shape_cast %176 : vector<1x384x128xf32> to vector<384x128xf32>
    %cst_93 = arith.constant dense<0.000000e+00> : vector<16x128xf32>
    %178 = tpu.matmul %175, %177, %cst_93 {dimension_numbers = #tpu.dot_dimension_numbers<[1], [0], [0], [1], [0, 0, 1, 1], [], []>} : vector<16x384xf32>, vector<384x128xf32>, vector<16x128xf32> -> vector<16x128xf32>
    %c2_94 = arith.constant 2 : index
    %c0_95 = arith.constant 0 : index
    %c0_96 = arith.constant 0 : index
    %179 = vector.load %arg7[%c2_94, %c0_95, %c0_96] : memref<3x1x128xf32, #tpu.memory_space<vmem>>, vector<1x1x128xf32>
    %180 = vector.shape_cast %179 : vector<1x1x128xf32> to vector<1x128xf32>
    %181 = vector.broadcast %180 : vector<1x128xf32> to vector<16x128xf32>
    %182 = arith.addf %178, %181 : vector<16x128xf32>
    %c2_97 = arith.constant 2 : index
    %c0_98 = arith.constant 0 : index
    %c0_99 = arith.constant 0 : index
    %183 = vector.load %arg9[%c2_97, %c0_98, %c0_99] : memref<3x1x128xf32, #tpu.memory_space<vmem>>, vector<1x1x128xf32>
    %184 = vector.shape_cast %183 : vector<1x1x128xf32> to vector<1x128xf32>
    %c2_100 = arith.constant 2 : index
    %c0_101 = arith.constant 0 : index
    %c0_102 = arith.constant 0 : index
    %185 = vector.load %arg11[%c2_100, %c0_101, %c0_102] : memref<3x1x128xf32, #tpu.memory_space<vmem>>, vector<1x1x128xf32>
    %186 = vector.shape_cast %185 : vector<1x1x128xf32> to vector<1x128xf32>
    %187 = arith.mulf %182, %9 : vector<16x128xf32>
    %cst_103 = arith.constant dense<0.000000e+00> : vector<128xf32>
    %188 = vector.multi_reduction <add>, %187, %cst_103 [0] : vector<16x128xf32> to vector<128xf32>
    %189 = vector.shape_cast %188 : vector<128xf32> to vector<1x128xf32>
    %cst_104 = arith.constant 0.0833333358 : f32
    %190 = vector.broadcast %cst_104 : f32 to vector<1x128xf32>
    %191 = arith.mulf %189, %190 : vector<1x128xf32>
    %192 = arith.mulf %187, %187 : vector<16x128xf32>
    %cst_105 = arith.constant dense<0.000000e+00> : vector<128xf32>
    %193 = vector.multi_reduction <add>, %192, %cst_105 [0] : vector<16x128xf32> to vector<128xf32>
    %194 = vector.shape_cast %193 : vector<128xf32> to vector<1x128xf32>
    %cst_106 = arith.constant 0.0833333358 : f32
    %195 = vector.broadcast %cst_106 : f32 to vector<1x128xf32>
    %196 = arith.mulf %194, %195 : vector<1x128xf32>
    %197 = arith.mulf %191, %191 : vector<1x128xf32>
    %198 = arith.subf %196, %197 : vector<1x128xf32>
    %199 = vector.broadcast %191 : vector<1x128xf32> to vector<16x128xf32>
    %200 = arith.subf %182, %199 : vector<16x128xf32>
    %201 = vector.broadcast %184 : vector<1x128xf32> to vector<16x128xf32>
    %202 = arith.mulf %201, %200 : vector<16x128xf32>
    %cst_107 = arith.constant 9.99999974E-6 : f32
    %203 = vector.broadcast %cst_107 : f32 to vector<1x128xf32>
    %204 = arith.addf %198, %203 : vector<1x128xf32>
    %205 = math.rsqrt %204 : vector<1x128xf32>
    %206 = vector.broadcast %205 : vector<1x128xf32> to vector<16x128xf32>
    %207 = arith.mulf %202, %206 : vector<16x128xf32>
    %208 = vector.broadcast %186 : vector<1x128xf32> to vector<16x128xf32>
    %209 = arith.addf %207, %208 : vector<16x128xf32>
    %210 = arith.mulf %209, %9 : vector<16x128xf32>
    %cst_108 = arith.constant dense<0.000000e+00> : vector<16x128xf32>
    %211 = tpu.matmul %2, %170, %cst_108 {dimension_numbers = #tpu.dot_dimension_numbers<[1], [0], [0], [1], [0, 0, 1, 1], [], []>} : vector<16x16xf32>, vector<16x128xf32>, vector<16x128xf32> -> vector<16x128xf32>
    %212 = tpu.concatenate %211, %172 in 1 : vector<16x128xf32>, vector<16x128xf32> -> vector<16x256xf32>
    %c2_109 = arith.constant 2 : index
    %c0_110 = arith.constant 0 : index
    %c0_111 = arith.constant 0 : index
    %213 = vector.load %arg6[%c2_109, %c0_110, %c0_111] : memref<3x256x128xf32, #tpu.memory_space<vmem>>, vector<1x256x128xf32>
    %214 = vector.shape_cast %213 : vector<1x256x128xf32> to vector<256x128xf32>
    %cst_112 = arith.constant dense<0.000000e+00> : vector<16x128xf32>
    %215 = tpu.matmul %212, %214, %cst_112 {dimension_numbers = #tpu.dot_dimension_numbers<[1], [0], [0], [1], [0, 0, 1, 1], [], []>} : vector<16x256xf32>, vector<256x128xf32>, vector<16x128xf32> -> vector<16x128xf32>
    %c2_113 = arith.constant 2 : index
    %c0_114 = arith.constant 0 : index
    %c0_115 = arith.constant 0 : index
    %216 = vector.load %arg8[%c2_113, %c0_114, %c0_115] : memref<3x1x128xf32, #tpu.memory_space<vmem>>, vector<1x1x128xf32>
    %217 = vector.shape_cast %216 : vector<1x1x128xf32> to vector<1x128xf32>
    %218 = vector.broadcast %217 : vector<1x128xf32> to vector<16x128xf32>
    %219 = arith.addf %215, %218 : vector<16x128xf32>
    %c2_116 = arith.constant 2 : index
    %c0_117 = arith.constant 0 : index
    %c0_118 = arith.constant 0 : index
    %220 = vector.load %arg10[%c2_116, %c0_117, %c0_118] : memref<3x1x128xf32, #tpu.memory_space<vmem>>, vector<1x1x128xf32>
    %221 = vector.shape_cast %220 : vector<1x1x128xf32> to vector<1x128xf32>
    %c2_119 = arith.constant 2 : index
    %c0_120 = arith.constant 0 : index
    %c0_121 = arith.constant 0 : index
    %222 = vector.load %arg12[%c2_119, %c0_120, %c0_121] : memref<3x1x128xf32, #tpu.memory_space<vmem>>, vector<1x1x128xf32>
    %223 = vector.shape_cast %222 : vector<1x1x128xf32> to vector<1x128xf32>
    %224 = arith.mulf %219, %14 : vector<16x128xf32>
    %cst_122 = arith.constant dense<0.000000e+00> : vector<128xf32>
    %225 = vector.multi_reduction <add>, %224, %cst_122 [0] : vector<16x128xf32> to vector<128xf32>
    %226 = vector.shape_cast %225 : vector<128xf32> to vector<1x128xf32>
    %cst_123 = arith.constant 6.250000e-02 : f32
    %227 = vector.broadcast %cst_123 : f32 to vector<1x128xf32>
    %228 = arith.mulf %226, %227 : vector<1x128xf32>
    %229 = arith.mulf %224, %224 : vector<16x128xf32>
    %cst_124 = arith.constant dense<0.000000e+00> : vector<128xf32>
    %230 = vector.multi_reduction <add>, %229, %cst_124 [0] : vector<16x128xf32> to vector<128xf32>
    %231 = vector.shape_cast %230 : vector<128xf32> to vector<1x128xf32>
    %cst_125 = arith.constant 6.250000e-02 : f32
    %232 = vector.broadcast %cst_125 : f32 to vector<1x128xf32>
    %233 = arith.mulf %231, %232 : vector<1x128xf32>
    %234 = arith.mulf %228, %228 : vector<1x128xf32>
    %235 = arith.subf %233, %234 : vector<1x128xf32>
    %236 = vector.broadcast %228 : vector<1x128xf32> to vector<16x128xf32>
    %237 = arith.subf %219, %236 : vector<16x128xf32>
    %238 = vector.broadcast %221 : vector<1x128xf32> to vector<16x128xf32>
    %239 = arith.mulf %238, %237 : vector<16x128xf32>
    %cst_126 = arith.constant 9.99999974E-6 : f32
    %240 = vector.broadcast %cst_126 : f32 to vector<1x128xf32>
    %241 = arith.addf %235, %240 : vector<1x128xf32>
    %242 = math.rsqrt %241 : vector<1x128xf32>
    %243 = vector.broadcast %242 : vector<1x128xf32> to vector<16x128xf32>
    %244 = arith.mulf %239, %243 : vector<16x128xf32>
    %245 = vector.broadcast %223 : vector<1x128xf32> to vector<16x128xf32>
    %246 = arith.addf %244, %245 : vector<16x128xf32>
    %247 = arith.mulf %246, %14 : vector<16x128xf32>
    %c0_127 = arith.constant 0 : index
    %c0_128 = arith.constant 0 : index
    %248 = vector.load %arg13[%c0_127, %c0_128] : memref<16x128xf32, #tpu.memory_space<vmem>>, vector<16x128xf32>
    tpu.vector_store %arg13[%c0_127, %c0_128], %210 {strides = array<i32>} : memref<16x128xf32, #tpu.memory_space<vmem>>, vector<16x128xf32>,
    %c0_129 = arith.constant 0 : index
    %c0_130 = arith.constant 0 : index
    %249 = vector.load %arg14[%c0_129, %c0_130] : memref<16x128xf32, #tpu.memory_space<vmem>>, vector<16x128xf32>
    tpu.vector_store %arg14[%c0_129, %c0_130], %247 {strides = array<i32>} : memref<16x128xf32, #tpu.memory_space<vmem>>, vector<16x128xf32>,
    return
  }
}

</mosaic_0001>

<bundles_post_ra>
// kernel: tpu_custom_call.1
= control target key start
LH: loop header
LB: loop body
LE: loop exit
PB: predicated region body
PF: predicated region fallthrough
CT: control target
= control target key end

     0   :  { %20 = vsyncpa [#allocation3], 0  ;;  %s3251_s0 = inlined_call_operand.hbm [shape: f32[16,128], index: 0, kind: input, shape index: {}]   ;;  %s3252_s1 = inlined_call_operand.hbm [shape: f32[16,128], index: 1, kind: input, shape index: {}]   ;;  %s3253_s2 = inlined_call_operand.hbm [shape: f32[16,16], index: 2, kind: input, shape index: {}]   ;;  %s3254_s3 = inlined_call_operand.hbm [shape: f32[16,16], index: 3, kind: input, shape index: {}]   ;;  %s3255_s4 = inlined_call_operand.hbm [shape: f32[16,16], index: 4, kind: input, shape index: {}]   ;;  %s3256_s5 = inlined_call_operand.hbm [shape: f32[3,384,128], index: 5, kind: input, shape index: {}]   ;;  %s3257_s6 = inlined_call_operand.hbm [shape: f32[3,256,128], index: 6, kind: input, shape index: {}]   ;;  %s3258_s7 = inlined_call_operand.vmem [shape: f32[3,1,128], index: 7, kind: input, shape index: {}]   ;;  %s3259_s8 = inlined_call_operand.vmem [shape: f32[3,1,128], index: 8, kind: input, shape index: {}]   ;;  %s3260_s9 = inlined_call_operand.vmem [shape: f32[3,1,128], index: 9, kind: input, shape index: {}]   ;;  %s3261_s10 = inlined_call_operand.vmem [shape: f32[3,1,128], index: 10, kind: input, shape index: {}]   ;;  %s3262_s11 = inlined_call_operand.vmem [shape: f32[3,1,128], index: 11, kind: input, shape index: {}]   ;;  %s3263_s12 = inlined_call_operand.vmem [shape: f32[3,1,128], index: 12, kind: input, shape index: {}]   ;;  %s3264_s13 = inlined_call_operand.hbm [shape: f32[16,128], index: 13, kind: output, shape index: {0}]   ;;  %s3265_s14 = inlined_call_operand.hbm [shape: f32[16,128], index: 14, kind: output, shape index: {1}]  }
   0x1   :  { %21 = vsyncpa [#allocation6], 0 }
   0x2   :  { %22 = vsyncpa [#allocation9], 0 }
   0x3   :  { %23 = vsyncpa [#allocation12], 0 }
   0x4   :  { %24 = vsyncpa [#allocation4], 0 }
   0x5   :  { %25 = vsyncpa [#allocation16], 0  ;;  %s2927_s29 = smov [#allocation5]   ;;  %s2928_s15 = smov [#allocation8]  }
   0x6   :  { %s43_s30 = sshll.u32 %s2927_s29, 4  ;;  %s67_s16 = sshll.u32 %s2928_s15, 4  ;;  %s44_s30 = int_to_ptr.vmem [resolvable:$true] %s43_s30  ;;  %s68_s16 = int_to_ptr.vmem [resolvable:$true] %s67_s16 }
   0x7   :  { %s2743_s17 = scalar_lea.vmem %s44_s30, 256  ;;  %p2748_p1 = scmp.lt.s32.totalorder %s44_s30, %s44_s30 }
   0x8   :  { %p2744_p0 = scmp.ne.s32.totalorder %s44_s30, %s2743_s17  ;;  %p2749_p2 = scmp.lt.s32.totalorder %s2743_s17, %s2743_s17 }
   0xa   :  { %p2750_p3 = por %p2749_p2, %p2748_p1 }
   0xc   :  { %p2751_p4 = pnand %p2750_p3, %p2744_p0 }
   0xe   :  { %2754 = shalt.err (!%p2751_p4)
}
   0xf   :  { %s2929_s18 = smov 128   ;;  %s2930_s19 = smov 8  }
  0x10   :  { %49 = dma.hbm_to_vmem [thread:$0]  %s3252_s1, 256, %s44_s30, [#allocation6], %s2929_s18, %s2929_s18, %s2930_s19  }
  0x11   :  { %s2763_s22 = scalar_lea.vmem %s68_s16, 256  ;;  %p2768_p6 = scmp.lt.s32.totalorder %s68_s16, %s68_s16 }
  0x12   :  { %p2764_p5 = scmp.ne.s32.totalorder %s68_s16, %s2763_s22  ;;  %p2769_p7 = scmp.lt.s32.totalorder %s2763_s22, %s2763_s22 }
  0x14   :  { %p2770_p8 = por %p2769_p7, %p2768_p6 }
  0x16   :  { %p2771_p9 = pnand %p2770_p8, %p2764_p5 }
  0x18   :  { %2774 = shalt.err (!%p2771_p9)
}
  0x19   :  { %73 = dma.hbm_to_vmem [thread:$0]  %s3254_s3, 256, %s68_s16, [#allocation9], %s2929_s18, %s2929_s18, %s2930_s19  }
  0x1a   :  { %s2931_s25 = smov [#allocation11]   ;;  %s2932_s27 = smov [#allocation2]  }
  0x1b   :  { %s91_s26 = sshll.u32 %s2931_s25, 4  ;;  %s31_s28 = sshll.u32 %s2932_s27, 4  ;;  %s92_s26 = int_to_ptr.vmem [resolvable:$true] %s91_s26  ;;  %s32_s28 = int_to_ptr.vmem [resolvable:$true] %s31_s28 }
  0x1c   :  { %s2783_s1 = scalar_lea.vmem %s92_s26, 18432  ;;  %p2788_p11 = scmp.lt.s32.totalorder %s92_s26, %s92_s26 }
  0x1d   :  { %p2784_p10 = scmp.ne.s32.totalorder %s92_s26, %s2783_s1  ;;  %p2789_p12 = scmp.lt.s32.totalorder %s2783_s1, %s2783_s1 }
  0x1f   :  { %p2790_p13 = por %p2789_p12, %p2788_p11 }
  0x21   :  { %p2791_p0 = pnand %p2790_p13, %p2784_p10 }
  0x23   :  { %2794 = shalt.err (!%p2791_p0)
}
  0x24   :  { %97 = dma.hbm_to_vmem [thread:$0]  %s3256_s5, 18432, %s92_s26, [#allocation12], %s2929_s18, %s2929_s18, %s2930_s19  }
  0x25   :  { %s2803_s3 = scalar_lea.vmem %s32_s28, 256  ;;  %p2808_p2 = scmp.lt.s32.totalorder %s32_s28, %s32_s28 }
  0x26   :  { %p2804_p1 = scmp.ne.s32.totalorder %s32_s28, %s2803_s3  ;;  %p2809_p3 = scmp.lt.s32.totalorder %s2803_s3, %s2803_s3 }
  0x28   :  { %p2810_p4 = por %p2809_p3, %p2808_p2 }
  0x2a   :  { %p2811_p5 = pnand %p2810_p4, %p2804_p1 }
  0x2c   :  { %2814 = shalt.err (!%p2811_p5)
}
  0x2d   :  { %37 = dma.hbm_to_vmem [thread:$0]  %s3251_s0, 256, %s32_s28, [#allocation3], %s2929_s18, %s2929_s18, %s2930_s19  }
  0x2e   :  { %s2933_s17 = smov [#allocation7]   ;;  %s2934_s21 = smov [#allocation10]  }
  0x2f   :  { %s55_s20 = sshll.u32 %s2933_s17, 4  ;;  %s79_s22 = sshll.u32 %s2934_s21, 4  ;;  %s56_s20 = int_to_ptr.vmem [resolvable:$true] %s55_s20  ;;  %s80_s22 = int_to_ptr.vmem [resolvable:$true] %s79_s22 }
  0x30   :  { %s2823_s5 = scalar_lea.vmem %s56_s20, 256  ;;  %p2828_p7 = scmp.lt.s32.totalorder %s56_s20, %s56_s20 }
  0x31   :  { %p2824_p6 = scmp.ne.s32.totalorder %s56_s20, %s2823_s5  ;;  %p2829_p8 = scmp.lt.s32.totalorder %s2823_s5, %s2823_s5 }
  0x33   :  { %p2830_p9 = por %p2829_p8, %p2828_p7 }
  0x35   :  { %p2831_p10 = pnand %p2830_p9, %p2824_p6 }
  0x37   :  { %2834 = shalt.err (!%p2831_p10)
}
  0x38   :  { %61 = dma.hbm_to_vmem [thread:$0]  %s3253_s2, 256, %s56_s20, [#allocation6], %s2929_s18, %s2929_s18, %s2930_s19  }
  0x39   :  { %s2843_s0 = scalar_lea.vmem %s80_s22, 256  ;;  %p2848_p12 = scmp.lt.s32.totalorder %s80_s22, %s80_s22 }
  0x3a   :  { %p2844_p11 = scmp.ne.s32.totalorder %s80_s22, %s2843_s0  ;;  %p2849_p13 = scmp.lt.s32.totalorder %s2843_s0, %s2843_s0 }
  0x3c   :  { %p2850_p0 = por %p2849_p13, %p2848_p12 }
  0x3e   :  { %p2851_p1 = pnand %p2850_p0, %p2844_p11 }
  0x40   :  { %2854 = shalt.err (!%p2851_p1)
}
  0x41   :  { %85 = dma.hbm_to_vmem [thread:$0]  %s3255_s4, 256, %s80_s22, [#allocation9], %s2929_s18, %s2929_s18, %s2930_s19  }
  0x42   :  { %s2935_s27 = smov [#allocation13]  }
  0x43   :  { %s103_s28 = sshll.u32 %s2935_s27, 4  ;;  %s104_s28 = int_to_ptr.vmem [resolvable:$true] %s103_s28 }
  0x44   :  { %s2863_s1 = scalar_lea.vmem %s104_s28, 12288  ;;  %p2868_p3 = scmp.lt.s32.totalorder %s104_s28, %s104_s28 }
  0x45   :  { %p2864_p2 = scmp.ne.s32.totalorder %s104_s28, %s2863_s1  ;;  %p2869_p4 = scmp.lt.s32.totalorder %s2863_s1, %s2863_s1 }
  0x47   :  { %p2870_p5 = por %p2869_p4, %p2868_p3 }
  0x49   :  { %p2871_p6 = pnand %p2870_p5, %p2864_p2 }
  0x4b   :  { %2874 = shalt.err (!%p2871_p6)
}
  0x4c   :  { %109 = dma.hbm_to_vmem [thread:$0]  %s3257_s6, 12288, %s104_s28, [#allocation12], %s2929_s18, %s2929_s18, %s2930_s19  }
  0x4d   :  { %2915 = dma.done.wait [#allocation3], 256  }
  0x4e   :  { %2916 = vsyncadd [#allocation3], 4294967040 }
  0x4f   :  { %2917 = dma.done.wait [#allocation6], 512  }
  0x50   :  { %2918 = vsyncadd [#allocation6], 4294966784 }
  0x51   :  { %2919 = dma.done.wait [#allocation9], 512  }
  0x52   :  { %2920 = vsyncadd [#allocation9], 4294966784 }
  0x53   :  { %2921 = dma.done.wait [#allocation12], 30720  }
  0x54   :  { %2922 = vsyncadd [#allocation12], 4294936576  ;;  %vm168_vm0 = vcmask 130048   ;;  %v3056_v0 = vld [vmem:[#allocation5 + $0x8] sm:$0xff]  ;;  %v3058_v1 = vld [vmem:[#allocation5] sm:$0xff]  ;;  %s2937_s22 = smov [#allocation14]  }
  0x55   :  { %v3060_v2 = vld [vmem:[#allocation8] sm:$0xff]  ;;  %2538 = vmatprep.subr.mxu1 %v3056_v0  ;;  %v3066_v3 = vld [vmem:[#allocation8 + $0x8] sm:$0xff]  ;;  %v3068_v4 = vld [vmem:[#allocation2 + $0x8] sm:$0xff]  ;;  %s2140_s5 = sshll.u32 %s2937_s22, 4  ;;  %s2141_s5 = int_to_ptr.vmem [resolvable:$true] %s2140_s5 }
  0x56   :  { %2542 = vmatprep.mubr.msk.f32.mxu1 %vm168_vm0, %v3060_v2  ;;  %2539 = vmatpush3.msra.mxu1 %v3056_v0  ;;  %v3071_v5 = vld [vmem:[#allocation10] sm:$0xff]  ;;  %v3082_v7 = vld [vmem:[#allocation10 + $0x8] sm:$0xff]  ;;  %v376_v12 = vld [vmem:[#allocation11 + $0x168] sm:$0xff]  ;;  %p2880_p8 = scmp.lt.s32.totalorder %s2141_s5, %s2141_s5 }
  0x57   :  { %2540 = vmatprep.subr.mxu1 %v3058_v1  ;;  %v3074_v6 = vld [vmem:[#allocation2] sm:$0xff]  ;;  %v378_v8 = vld [vmem:[#allocation11 + $0x178] sm:$0xff]  ;;  %v375_v15 = vld [vmem:[#allocation11 + $0x160] sm:$0xff] }
  0x58   :  { %2541 = vmatpush3.msra.mxu1 %v3058_v1  ;;  %v377_v9 = vld [vmem:[#allocation11 + $0x170] sm:$0xff]  ;;  %v362_v10 = vld [vmem:[#allocation11 + $0xf8] sm:$0xff]  ;;  %v360_v16 = vld [vmem:[#allocation11 + $0xe8] sm:$0xff] }
  0x59   :  { %2543 = vmatmul.mubr.msk.f32.vlgmr.msra.gmra.mxu1 %vm168_vm0, %v3066_v3  ;;  %2545 = vmatprep.subr.mxu1 %v3068_v4  ;;  %v346_v11 = vld [vmem:[#allocation11 + $0x78] sm:$0xff]  ;;  %v361_v13 = vld [vmem:[#allocation11 + $0xf0] sm:$0xff]  ;;  %v344_v17 = vld [vmem:[#allocation11 + $0x68] sm:$0xff] }
  0x5a   :  { %2546 = vmatpush3.msra.mxu1 %v3068_v4  ;;  %2549 = vmatprep.mubr.msk.f32.mxu1 %vm168_vm0, %v3071_v5  ;;  %v345_v14 = vld [vmem:[#allocation11 + $0x70] sm:$0xff]  ;;  %v374_v18 = vld [vmem:[#allocation11 + $0x158] sm:$0xff]  ;;  %v359_v19 = vld [vmem:[#allocation11 + $0xe0] sm:$0xff] }
  0x5b   :  { %2547 = vmatprep.subr.mxu1 %v3074_v6  ;;  %2228 = vmatprep.subr.mxu0 %v362_v10  ;;  %v343_v20 = vld [vmem:[#allocation11 + $0x60] sm:$0xff]  ;;  %v373_v21 = vld [vmem:[#allocation11 + $0x150] sm:$0xff]  ;;  %v358_v22 = vld [vmem:[#allocation11 + $0xd8] sm:$0xff] }
  0x5c   :  { %2548 = vmatpush3.msra.mxu1 %v3074_v6  ;;  %2229 = vmatpush3.msra.mxu0 %v346_v11  ;;  %v342_v23 = vld [vmem:[#allocation11 + $0x58] sm:$0xff]  ;;  %v372_v24 = vld [vmem:[#allocation11 + $0x148] sm:$0xff]  ;;  %v357_v25 = vld [vmem:[#allocation11 + $0xd0] sm:$0xff] }
  0x5d   :  { %2550 = vmatmul.mubr.msk.f32.vlgmr.msra.gmra.mxu1 %vm168_vm0, %v3082_v7  ;;  %2552 = vmatprep.subr.mxu1 %v378_v8  ;;  %v341_v26 = vld [vmem:[#allocation11 + $0x50] sm:$0xff]  ;;  %v371_v27 = vld [vmem:[#allocation11 + $0x140] sm:$0xff]  ;;  %v356_v28 = vld [vmem:[#allocation11 + $0xc8] sm:$0xff] }
  0x5e   :  { %2553 = vmatpush3.msra.mxu1 %v378_v8  ;;  %2584 = vmatprep.mubr.f32.mxu1 %v3074_v6  ;;  %v340_v29 = vld [vmem:[#allocation11 + $0x48] sm:$0xff]  ;;  %v370_v30 = vld [vmem:[#allocation11 + $0x138] sm:$0xff]  ;;  %v355_v31 = vld [vmem:[#allocation11 + $0xc0] sm:$0xff] }
  0x5f   :  { %2554 = vmatprep.subr.mxu1 %v377_v9  ;;  %2230 = vmatprep.subr.mxu0 %v361_v13  ;;  %v339_v32 = vld [vmem:[#allocation11 + $0x40] sm:$0xff]  ;;  %v369_v33 = vld [vmem:[#allocation11 + $0x130] sm:$0xff]  ;;  %v354_v34 = vld [vmem:[#allocation11 + $0xb8] sm:$0xff] }
  0x60   :  { %2555 = vmatpush3.msra.mxu1 %v377_v9  ;;  %2231 = vmatpush3.msra.mxu0 %v345_v14  ;;  %v338_v35 = vld [vmem:[#allocation11 + $0x38] sm:$0xff]  ;;  %v368_v36 = vld [vmem:[#allocation11 + $0x128] sm:$0xff]  ;;  %v353_v37 = vld [vmem:[#allocation11 + $0xb0] sm:$0xff] }
  0x61   :  { %2556 = vmatprep.subr.mxu1 %v376_v12  ;;  %2232 = vmatprep.subr.mxu0 %v360_v16  ;;  %v337_v38 = vld [vmem:[#allocation11 + $0x30] sm:$0xff]  ;;  %v367_v39 = vld [vmem:[#allocation11 + $0x120] sm:$0xff]  ;;  %v352_v40 = vld [vmem:[#allocation11 + $0xa8] sm:$0xff] }
  0x62   :  { %2557 = vmatpush3.msra.mxu1 %v376_v12  ;;  %2233 = vmatpush3.msra.mxu0 %v344_v17  ;;  %v336_v41 = vld [vmem:[#allocation11 + $0x28] sm:$0xff]  ;;  %v366_v42 = vld [vmem:[#allocation11 + $0x118] sm:$0xff]  ;;  %v351_v43 = vld [vmem:[#allocation11 + $0xa0] sm:$0xff] }
  0x63   :  { %2558 = vmatprep.subr.mxu1 %v375_v15  ;;  %2234 = vmatprep.subr.mxu0 %v359_v19  ;;  %v335_v44 = vld [vmem:[#allocation11 + $0x20] sm:$0xff]  ;;  %v365_v45 = vld [vmem:[#allocation11 + $0x110] sm:$0xff]  ;;  %v364_v46 = vld [vmem:[#allocation11 + $0x108] sm:$0xff] }
  0x64   :  { %2559 = vmatpush3.msra.mxu1 %v375_v15  ;;  %2235 = vmatpush3.msra.mxu0 %v343_v20  ;;  %v363_v47 = vld [vmem:[#allocation11 + $0x100] sm:$0xff]  ;;  %v3089_v48 = vld [vmem:[#allocation7] sm:$0xff]  ;;  %v3096_v49 = vld [vmem:[#allocation7 + $0x8] sm:$0xff] }
  0x65   :  { %2560 = vmatprep.subr.mxu1 %v374_v18  ;;  %2236 = vmatprep.subr.mxu0 %v358_v22  ;;  %v350_v50 = vld [vmem:[#allocation11 + $0x98] sm:$0xff]  ;;  %v349_v52 = vld [vmem:[#allocation11 + $0x90] sm:$0xff]  ;;  %v348_v54 = vld [vmem:[#allocation11 + $0x88] sm:$0xff] }
  0x66   :  { %2561 = vmatpush3.msra.mxu1 %v374_v18  ;;  %2237 = vmatpush3.msra.mxu0 %v342_v23  ;;  %v334_v51 = vld [vmem:[#allocation11 + $0x18] sm:$0xff]  ;;  %v333_v53 = vld [vmem:[#allocation11 + $0x10] sm:$0xff]  ;;  %v332_v55 = vld [vmem:[#allocation11 + $0x8] sm:$0xff] }
  0x67   :  { %2562 = vmatprep.subr.mxu1 %v373_v21  ;;  %2238 = vmatprep.subr.mxu0 %v357_v25  ;;  %v347_v56 = vld [vmem:[#allocation11 + $0x80] sm:$0xff]  ;;  %v696_v58 = vld [vmem:[#allocation13 + $0xf8] sm:$0xff]  ;;  %v678_v8 = vld [vmem:[#allocation13 + $0x68] sm:$0xff] }
  0x68   :  { %2563 = vmatpush3.msra.mxu1 %v373_v21  ;;  %2239 = vmatpush3.msra.mxu0 %v341_v26  ;;  %v331_v57 = vld [vmem:[#allocation11] sm:$0xff]  ;;  %v680_v63 = vld [vmem:[#allocation13 + $0x78] sm:$0xff]  ;;  %v691_v13 = vld [vmem:[#allocation13 + $0xd0] sm:$0xff] }
  0x69   :  { %2564 = vmatprep.subr.mxu1 %v372_v24  ;;  %2240 = vmatprep.subr.mxu0 %v356_v28  ;;  %v693_v9 = vld [vmem:[#allocation13 + $0xe0] sm:$0xff]  ;;  %v692_v11 = vld [vmem:[#allocation13 + $0xd8] sm:$0xff]  ;;  %v675_v14 = vld [vmem:[#allocation13 + $0x50] sm:$0xff] }
  0x6a   :  { %2565 = vmatpush3.msra.mxu1 %v372_v24  ;;  %2241 = vmatpush3.msra.mxu0 %v340_v29  ;;  %v677_v10 = vld [vmem:[#allocation13 + $0x60] sm:$0xff]  ;;  %v676_v12 = vld [vmem:[#allocation13 + $0x58] sm:$0xff]  ;;  %v690_v15 = vld [vmem:[#allocation13 + $0xc8] sm:$0xff] }
  0x6b   :  { %2566 = vmatprep.subr.mxu1 %v371_v27  ;;  %2242 = vmatprep.subr.mxu0 %v355_v31  ;;  %v674_v16 = vld [vmem:[#allocation13 + $0x48] sm:$0xff]  ;;  %v689_v17 = vld [vmem:[#allocation13 + $0xc0] sm:$0xff]  ;;  %v688_v19 = vld [vmem:[#allocation13 + $0xb8] sm:$0xff] }
  0x6c   :  { %2567 = vmatpush3.msra.mxu1 %v371_v27  ;;  %2243 = vmatpush3.msra.mxu0 %v339_v32  ;;  %v673_v18 = vld [vmem:[#allocation13 + $0x40] sm:$0xff]  ;;  %v672_v20 = vld [vmem:[#allocation13 + $0x38] sm:$0xff]  ;;  %v671_v21 = vld [vmem:[#allocation13 + $0x30] sm:$0xff] }
  0x6d   :  { %2568 = vmatprep.subr.mxu1 %v370_v30  ;;  %2244 = vmatprep.subr.mxu0 %v354_v34  ;;  %v686_v22 = vld [vmem:[#allocation13 + $0xa8] sm:$0xff]  ;;  %v685_v24 = vld [vmem:[#allocation13 + $0xa0] sm:$0xff]  ;;  %v684_v26 = vld [vmem:[#allocation13 + $0x98] sm:$0xff] }
  0x6e   :  { %2569 = vmatpush3.msra.mxu1 %v370_v30  ;;  %2245 = vmatpush3.msra.mxu0 %v338_v35  ;;  %v670_v23 = vld [vmem:[#allocation13 + $0x28] sm:$0xff]  ;;  %v669_v25 = vld [vmem:[#allocation13 + $0x20] sm:$0xff]  ;;  %v668_v27 = vld [vmem:[#allocation13 + $0x18] sm:$0xff] }
  0x6f   :  { %2570 = vmatprep.subr.mxu1 %v369_v33  ;;  %2246 = vmatprep.subr.mxu0 %v353_v37  ;;  %v683_v28 = vld [vmem:[#allocation13 + $0x90] sm:$0xff]  ;;  %v682_v30 = vld [vmem:[#allocation13 + $0x88] sm:$0xff]  ;;  %v681_v32 = vld [vmem:[#allocation13 + $0x80] sm:$0xff] }
  0x70   :  { %2571 = vmatpush3.msra.mxu1 %v369_v33  ;;  %2247 = vmatpush3.msra.mxu0 %v337_v38  ;;  %v667_v29 = vld [vmem:[#allocation13 + $0x10] sm:$0xff]  ;;  %v666_v31 = vld [vmem:[#allocation13 + $0x8] sm:$0xff]  ;;  %v665_v34 = vld [vmem:[#allocation13] sm:$0xff] }
  0x71   :  { %2572 = vmatprep.subr.mxu1 %v368_v36  ;;  %2248 = vmatprep.subr.mxu0 %v352_v40  ;;  %v1029_v38 = vld [vmem:[#allocation11 + $0x2f8] sm:$0xff]  ;;  %v1027_v40 = vld [vmem:[#allocation11 + $0x2e8] sm:$0xff] }
  0x72   :  { %2573 = vmatpush3.msra.mxu1 %v368_v36  ;;  %2249 = vmatpush3.msra.mxu0 %v336_v41  ;;  %v1026_v41 = vld [vmem:[#allocation11 + $0x2e0] sm:$0xff] }
  0x73   :  { %2574 = vmatprep.subr.mxu1 %v367_v39  ;;  %2250 = vmatprep.subr.mxu0 %v351_v43  ;;  %v1024_v43 = vld [vmem:[#allocation11 + $0x2d0] sm:$0xff] }
  0x74   :  { %2575 = vmatpush3.msra.mxu1 %v367_v39  ;;  %2251 = vmatpush3.msra.mxu0 %v335_v44  ;;  %v1028_v39 = vld [vmem:[#allocation11 + $0x2f0] sm:$0xff]  ;;  %v1022_v44 = vld [vmem:[#allocation11 + $0x2c0] sm:$0xff] }
  0x75   :  { %2576 = vmatprep.subr.mxu1 %v366_v42  ;;  %2252 = vmatprep.subr.mxu0 %v350_v50  ;;  %v1018_v50 = vld [vmem:[#allocation11 + $0x2a0] sm:$0xff] }
  0x76   :  { %2577 = vmatpush3.msra.mxu1 %v366_v42  ;;  %2253 = vmatpush3.msra.mxu0 %v334_v51  ;;  %v1025_v42 = vld [vmem:[#allocation11 + $0x2d8] sm:$0xff] }
  0x77   :  { %2578 = vmatprep.subr.mxu1 %v365_v45  ;;  %2254 = vmatprep.subr.mxu0 %v349_v52  ;;  %v1017_v51 = vld [vmem:[#allocation11 + $0x298] sm:$0xff]  ;;  %v1016_v52 = vld [vmem:[#allocation11 + $0x290] sm:$0xff] }
  0x78   :  { %2579 = vmatpush3.msra.mxu1 %v365_v45  ;;  %2255 = vmatpush3.msra.mxu0 %v333_v53  ;;  %v1021_v45 = vld [vmem:[#allocation11 + $0x2b8] sm:$0xff]  ;;  %v1015_v53 = vld [vmem:[#allocation11 + $0x288] sm:$0xff] }
  0x79   :  { %2580 = vmatprep.subr.mxu1 %v364_v46  ;;  %2256 = vmatprep.subr.mxu0 %v348_v54  ;;  %v1014_v54 = vld [vmem:[#allocation11 + $0x280] sm:$0xff] }
  0x7a   :  { %2581 = vmatpush3.msra.mxu1 %v364_v46  ;;  %2257 = vmatpush3.msra.mxu0 %v332_v55  ;;  %v1020_v46 = vld [vmem:[#allocation11 + $0x2b0] sm:$0xff]  ;;  %v153_v55 = vlaneseq }
  0x7b   :  { %2582 = vmatprep.subr.mxu1 %v363_v47  ;;  %2258 = vmatprep.subr.mxu0 %v347_v56 }
  0x7c   :  { %2583 = vmatpush3.msra.mxu1 %v363_v47  ;;  %2259 = vmatpush3.msra.mxu0 %v331_v57  ;;  %v1019_v47 = vld [vmem:[#allocation11 + $0x2a8] sm:$0xff]  ;;  %v154_v56 = vshrl.u32 %v153_v55, 7 }
  0x7d   :  { %2585 = vmatmul.mubr.f32.vlgmr.msra.gmra.mxu1 %v3068_v4  ;;  %2587 = vmatprep.subr.mxu1 %v3068_v4 }
  0x7e   :  { %2588 = vmatpush3.msra.mxu1 %v3068_v4  ;;  %2591 = vmatprep.mubr.msk.f32.mxu1 %vm168_vm0, %v3089_v48  ;;  %v679_v4 = vld [vmem:[#allocation13 + $0x70] sm:$0xff] }
  0x7f   :  { %2589 = vmatprep.subr.mxu1 %v3074_v6  ;;  %2288 = vmatprep.subr.mxu0 %v696_v58 }
  0x80   :  { %2590 = vmatpush3.msra.mxu1 %v3074_v6  ;;  %v694_v6 = vld [vmem:[#allocation13 + $0xe8] sm:$0xff] }
  0x81   :  { %2592 = vmatmul.mubr.msk.f32.vlgmr.msra.gmra.mxu1 %vm168_vm0, %v3096_v49 }
  0x82   :  { %2598 = vmatprep.mubr.msk.f32.mxu1 %vm168_vm0, %v3060_v2  ;;  %v695_v2 = vld [vmem:[#allocation13 + $0xf0] sm:$0xff] }
 0x119   :  { %v2544_v59 = vpop.f32.mrf.mxu1 }
 0x11b   :  { %v241_v60 = vpop.f32.mrf.mxu1 }
 0x11d   :  { %v2551_v61 = vpop.f32.mrf.mxu1 }
 0x11f   :  { %v322_v62 = vpop.f32.mrf.mxu1 }
 0x120   :  { %450 = vmatprep.mubr.f32.mxu0 %v322_v62 }
 0x121   :  { %451 = vmatmul.mubr.f32.vlgmr.msra.gmra.mxu0 %v241_v60  ;;  %v155_v60 = vadd.s32 8, %v154_v56 }
 0x122   :  { %455 = vmatprep.mubr.f32.mxu0 %v2551_v61  ;;  %2289 = vmatpush3.msra.mxu0 %v680_v63  ;;  %v2176_v61 = vld [vmem:[%s3258_s7] ss:$0 sm:$0xff] }
 0x123   :  { %2290 = vmatprep.subr.mxu0 %v695_v2  ;;  %vm157_vm1 = vcmp.lt.s32.totalorder %v155_v60, 12 }
 0x124   :  { %2291 = vmatpush3.msra.mxu0 %v679_v4 }
 0x125   :  { %456 = vmatmul.mubr.f32.gmra.mxu0 %v2544_v59  ;;  %2292 = vmatprep.subr.mxu0 %v694_v6 }
 0x126   :  { %2293 = vmatpush3.msra.mxu0 %v678_v8  ;;  %768 = vmatprep.mubr.f32.mxu0 %v3058_v1  ;;  %v687_v1 = vld [vmem:[#allocation13 + $0xb0] sm:$0xff]  ;;  %v2936_v8 = vmov 0.0  }
 0x127   :  { %2294 = vmatprep.subr.mxu0 %v693_v9  ;;  %v3113_v9 = vsel %vm157_vm1, 1.0, %v2936_v8 }
 0x128   :  { %2295 = vmatpush3.msra.mxu0 %v677_v10 }
 0x129   :  { %2296 = vmatprep.subr.mxu0 %v692_v11 }
 0x12a   :  { %2297 = vmatpush3.msra.mxu0 %v676_v12 }
 0x12b   :  { %2298 = vmatprep.subr.mxu0 %v691_v13 }
 0x12c   :  { %2299 = vmatpush3.msra.mxu0 %v675_v14 }
 0x12d   :  { %2300 = vmatprep.subr.mxu0 %v690_v15 }
 0x12e   :  { %2301 = vmatpush3.msra.mxu0 %v674_v16 }
 0x12f   :  { %2302 = vmatprep.subr.mxu0 %v689_v17 }
 0x130   :  { %2303 = vmatpush3.msra.mxu0 %v673_v18 }
 0x131   :  { %2304 = vmatprep.subr.mxu0 %v688_v19 }
 0x132   :  { %2305 = vmatpush3.msra.mxu0 %v672_v20 }
 0x133   :  { %2306 = vmatprep.subr.mxu0 %v687_v1 }
 0x134   :  { %2307 = vmatpush3.msra.mxu0 %v671_v21 }
 0x135   :  { %2308 = vmatprep.subr.mxu0 %v686_v22 }
 0x136   :  { %2309 = vmatpush3.msra.mxu0 %v670_v23 }
 0x137   :  { %2310 = vmatprep.subr.mxu0 %v685_v24 }
 0x138   :  { %2311 = vmatpush3.msra.mxu0 %v669_v25 }
 0x139   :  { %2312 = vmatprep.subr.mxu0 %v684_v26 }
 0x13a   :  { %2313 = vmatpush3.msra.mxu0 %v668_v27 }
 0x13b   :  { %2314 = vmatprep.subr.mxu0 %v683_v28 }
 0x13c   :  { %2315 = vmatpush3.msra.mxu0 %v667_v29 }
 0x13d   :  { %v3105_v33 = vpop.f32.mrf.mxu1  ;;  %2316 = vmatprep.subr.mxu0 %v682_v30 }
 0x13e   :  { %2317 = vmatpush3.msra.mxu0 %v666_v31 }
 0x13f   :  { %v3107_v35 = vpop.f32.mrf.mxu1  ;;  %2318 = vmatprep.subr.mxu0 %v681_v32 }
 0x140   :  { %2319 = vmatpush3.msra.mxu0 %v665_v34 }
 0x141   :  { %v2593_v36 = vpop.f32.mrf.mxu1  ;;  %2608 = vmatprep.subr.mxu0 %v1029_v38 }
 0x143   :  { %v656_v37 = vpop.f32.mrf.mxu1 }
 0x144   :  { %769 = vmatmul.mubr.f32.vlgmr.msra.gmra.mxu0 %v656_v37 }
 0x145   :  { %773 = vmatprep.mubr.f32.mxu0 %v3056_v0  ;;  %2609 = vmatpush3.msra.mxu0 %v1029_v38  ;;  %v1023_v0 = vld [vmem:[#allocation11 + $0x2c8] sm:$0xff] }
 0x146   :  { %2610 = vmatprep.subr.mxu0 %v1028_v39 }
 0x147   :  { %2611 = vmatpush3.msra.mxu0 %v1028_v39 }
 0x148   :  { %774 = vmatmul.mubr.f32.gmra.mxu0 %v2593_v36  ;;  %2612 = vmatprep.subr.mxu0 %v1027_v40  ;;  %v2181_v36 = vld [vmem:[%s3259_s8] ss:$0 sm:$0xff] }
 0x149   :  { %2613 = vmatpush3.msra.mxu0 %v1027_v40 }
 0x14a   :  { %2614 = vmatprep.subr.mxu0 %v1026_v41 }
 0x14b   :  { %2615 = vmatpush3.msra.mxu0 %v1026_v41 }
 0x14c   :  { %2616 = vmatprep.subr.mxu0 %v1025_v42 }
 0x14d   :  { %2617 = vmatpush3.msra.mxu0 %v1025_v42 }
 0x14e   :  { %2618 = vmatprep.subr.mxu0 %v1024_v43 }
 0x14f   :  { %2619 = vmatpush3.msra.mxu0 %v1024_v43 }
 0x150   :  { %2620 = vmatprep.subr.mxu0 %v1023_v0 }
 0x151   :  { %2621 = vmatpush3.msra.mxu0 %v1023_v0  ;;  %v2177_v0 = vld [vmem:[%s3260_s9] ss:$0 sm:$0xff] }
 0x152   :  { %2622 = vmatprep.subr.mxu0 %v1022_v44 }
 0x153   :  { %2623 = vmatpush3.msra.mxu0 %v1022_v44 }
 0x154   :  { %2624 = vmatprep.subr.mxu0 %v1021_v45 }
 0x155   :  { %2625 = vmatpush3.msra.mxu0 %v1021_v45 }
 0x156   :  { %2626 = vmatprep.subr.mxu0 %v1020_v46 }
 0x157   :  { %2627 = vmatpush3.msra.mxu0 %v1020_v46 }
 0x158   :  { %2628 = vmatprep.subr.mxu0 %v1019_v47 }
 0x159   :  { %2629 = vmatpush3.msra.mxu0 %v1019_v47 }
 0x15a   :  { %2630 = vmatprep.subr.mxu0 %v1018_v50 }
 0x15b   :  { %2631 = vmatpush3.msra.mxu0 %v1018_v50 }
 0x15c   :  { %2632 = vmatprep.subr.mxu0 %v1017_v51 }
 0x15d   :  { %2633 = vmatpush3.msra.mxu0 %v1017_v51 }
 0x15e   :  { %2634 = vmatprep.subr.mxu0 %v1016_v52 }
 0x15f   :  { %2635 = vmatpush3.msra.mxu0 %v1016_v52 }
 0x160   :  { %2636 = vmatprep.subr.mxu0 %v1015_v53 }
 0x161   :  { %2637 = vmatpush3.msra.mxu0 %v1015_v53 }
 0x162   :  { %2638 = vmatprep.subr.mxu0 %v1014_v54 }
 0x163   :  { %2639 = vmatpush3.msra.mxu0 %v1014_v54  ;;  %v2178_v54 = vld [vmem:[%s3262_s11] ss:$0 sm:$0xff] }
 0x1e1   :  { %v2260_v57 = vpop.f32.mrf.mxu0 }
 0x1e3   :  { %v2261_v58 = vpop.f32.mrf.mxu0 }
 0x1e4   :  { %v2262_v59 = vadd.f32 %v2261_v58, %v2260_v57 }
 0x1e5   :  { %v2263_v62 = vpop.f32.mrf.mxu0 }
 0x1e6   :  { %v453_v2 = vadd.f32 %v2262_v59, %v2176_v61 }
 0x1e7   :  { %v2264_v63 = vpop.f32.mrf.mxu0 }
 0x1e8   :  { %v2265_v4 = vadd.f32 %v2264_v63, %v2263_v62  ;;  %v528_v10 = vadd.f32 %v3107_v35, %v453_v2 }
 0x1ea   :  { %v458_v6 = vadd.f32 %v2265_v4, %v2176_v61  ;;  %v548_v13 = vmul.f32 %v528_v10, %v528_v10 }
 0x1ec   :  { %v533_v11 = vadd.f32 %v3105_v33, %v458_v6 }
 0x1ee   :  { %v539_v12 = vmul.f32 %v3113_v9, %v533_v11 }
 0x1f0   :  { %v540_v14 = vadd.f32 %v539_v12, %v528_v10  ;;  %v549_v15 = vmul.f32 %v539_v12, %v539_v12 }
 0x1f2   :  { %v541_v16 = vrot.slane %v540_v14, 4  ;;  %v550_v17 = vadd.f32 %v549_v15, %v548_v13 }
 0x1f4   :  { %v542_v18 = vadd.f32 %v541_v16, %v540_v14  ;;  %v551_v19 = vrot.slane %v550_v17, 4 }
 0x1f6   :  { %v543_v20 = vrot.slane %v542_v18, 2  ;;  %v552_v1 = vadd.f32 %v551_v19, %v550_v17 }
 0x1f8   :  { %v544_v21 = vadd.f32 %v543_v20, %v542_v18  ;;  %v553_v22 = vrot.slane %v552_v1, 2 }
 0x1fa   :  { %v545_v23 = vrot.slane %v544_v21, 1  ;;  %v554_v24 = vadd.f32 %v553_v22, %v552_v1 }
 0x1fc   :  { %v546_v25 = vadd.f32 %v545_v23, %v544_v21  ;;  %v555_v26 = vrot.slane %v554_v24, 1  ;;  %v2182_v21 = vld [vmem:[%s3261_s10] ss:$0 sm:$0xff] }
 0x1fe   :  { %v547_v27 = vmul.f32 0.083333336, %v546_v25  ;;  %v556_v28 = vadd.f32 %v555_v26, %v554_v24  ;;  %v2183_v25 = vld [vmem:[%s3263_s12] ss:$0 sm:$0xff] }
 0x200   :  { %v557_v29 = vmul.f32 0.083333336, %v556_v28  ;;  %v558_v30 = vmul.f32 %v547_v27, %v547_v27  ;;  %v560_v42 = vsub.f32 %v528_v10, %v547_v27  ;;  %v561_v43 = vsub.f32 %v533_v11, %v547_v27 }
 0x202   :  { %v559_v31 = vsub.f32 %v557_v29, %v558_v30  ;;  %v568_v51 = vmul.f32 %v2177_v0, %v560_v42  ;;  %v569_v52 = vmul.f32 %v2177_v0, %v561_v43  ;;  %v991_v42 = vld [vmem:[#allocation11 + $0x1c8] sm:$0xff]  ;;  %v1006_v43 = vld [vmem:[#allocation11 + $0x240] sm:$0xff] }
 0x203   :  { %v990_v0 = vld [vmem:[#allocation11 + $0x1c0] sm:$0xff] }
 0x204   :  { %v570_v32 = vadd.f32 1e-05, %v559_v31  ;;  %v2320_v33 = vpop.f32.mrf.mxu0 }
 0x206   :  { %2718 = vrsqrt.f32 %v570_v32  ;;  %v2321_v34 = vpop.f32.mrf.mxu0  ;;  %v1013_v32 = vld [vmem:[#allocation11 + $0x278] sm:$0xff] }
 0x207   :  { %v2322_v35 = vadd.f32 %v2321_v34, %v2320_v33  ;;  %v997_v33 = vld [vmem:[#allocation11 + $0x1f8] sm:$0xff]  ;;  %v1012_v34 = vld [vmem:[#allocation11 + $0x270] sm:$0xff] }
 0x208   :  { %v2323_v37 = vpop.f32.mrf.mxu0 }
 0x209   :  { %v771_v39 = vadd.f32 %v2322_v35, %v2181_v36  ;;  %v996_v35 = vld [vmem:[#allocation11 + $0x1f0] sm:$0xff] }
 0x20a   :  { %v2324_v38 = vpop.f32.mrf.mxu0 }
 0x20b   :  { %v2325_v40 = vadd.f32 %v2324_v38, %v2323_v37  ;;  %v791_v44 = vmul.f32 %v771_v39, %v771_v39  ;;  %v1010_v37 = vld [vmem:[#allocation11 + $0x260] sm:$0xff]  ;;  %v1009_v38 = vld [vmem:[#allocation11 + $0x258] sm:$0xff] }
 0x20d   :  { %v776_v41 = vadd.f32 %v2325_v40, %v2181_v36  ;;  %v995_v36 = vld [vmem:[#allocation11 + $0x1e8] sm:$0xff]  ;;  %v1008_v40 = vld [vmem:[#allocation11 + $0x250] sm:$0xff] }
 0x20f   :  { %v783_v45 = vadd.f32 %v776_v41, %v771_v39  ;;  %v792_v46 = vmul.f32 %v776_v41, %v776_v41 }
 0x211   :  { %v784_v47 = vrot.slane %v783_v45, 4  ;;  %v793_v50 = vadd.f32 %v792_v46, %v791_v44  ;;  %v1005_v44 = vld [vmem:[#allocation11 + $0x238] sm:$0xff]  ;;  %v1004_v46 = vld [vmem:[#allocation11 + $0x230] sm:$0xff] }
 0x213   :  { %v2719_v53 = vpop.eup %2718  ;;  %v785_v55 = vadd.f32 %v784_v47, %v783_v45  ;;  %v794_v56 = vrot.slane %v793_v50, 4  ;;  %v989_v45 = vld [vmem:[#allocation11 + $0x1b8] sm:$0xff]  ;;  %v988_v47 = vld [vmem:[#allocation11 + $0x1b0] sm:$0xff] }
 0x214   :  { %v572_v57 = vmul.f32 %v2719_v53, %v568_v51  ;;  %v573_v58 = vmul.f32 %v2719_v53, %v569_v52  ;;  %v987_v51 = vld [vmem:[#allocation11 + $0x1a8] sm:$0xff]  ;;  %v1002_v52 = vld [vmem:[#allocation11 + $0x220] sm:$0xff] }
 0x215   :  { %v786_v59 = vrot.slane %v785_v55, 2  ;;  %v795_v60 = vadd.f32 %v794_v56, %v793_v50  ;;  %v1003_v50 = vld [vmem:[#allocation11 + $0x228] sm:$0xff]  ;;  %v986_v53 = vld [vmem:[#allocation11 + $0x1a0] sm:$0xff]  ;;  %v1000_v56 = vld [vmem:[#allocation11 + $0x210] sm:$0xff] }
 0x216   :  { %v581_v61 = vadd.f32 %v2178_v54, %v573_v58  ;;  %v580_v62 = vadd.f32 %v2178_v54, %v572_v57  ;;  %v1001_v54 = vld [vmem:[#allocation11 + $0x218] sm:$0xff]  ;;  %v984_v57 = vld [vmem:[#allocation11 + $0x190] sm:$0xff]  ;;  %v999_v58 = vld [vmem:[#allocation11 + $0x208] sm:$0xff] }
 0x217   :  { %v787_v63 = vadd.f32 %v786_v59, %v785_v55  ;;  %v796_v2 = vrot.slane %v795_v60, 2  ;;  %v985_v55 = vld [vmem:[#allocation11 + $0x198] sm:$0xff]  ;;  %v983_v59 = vld [vmem:[#allocation11 + $0x188] sm:$0xff] }
 0x218   :  { %v3127_v4 = vmax.f32 %v580_v62, 0.0  ;;  %v583_v6 = vmul.f32 %v3113_v9, %v581_v61  ;;  %v982_v61 = vld [vmem:[#allocation11 + $0x180] sm:$0xff] }
 0x219   :  { %v788_v8 = vrot.slane %v787_v63, 1  ;;  %v797_v10 = vadd.f32 %v796_v2, %v795_v60  ;;  %v998_v60 = vld [vmem:[#allocation11 + $0x200] sm:$0xff] }
 0x21a   :  { %2640 = vmatprep.mubr.f32.mxu0 %v3127_v4  ;;  %v3131_v11 = vmax.f32 %v583_v6, 0.0 }
 0x21b   :  { %v789_v12 = vadd.f32 %v788_v8, %v787_v63  ;;  %v798_v13 = vrot.slane %v797_v10, 1  ;;  %v1345_v8 = vld [vmem:[#allocation13 + $0x1f8] sm:$0xff] }
 0x21c   :  { %2641 = vmatmul.mubr.f32.vlgmr.msra.gmra.mxu0 %v3131_v11 }
 0x21d   :  { %v790_v14 = vmul.f32 0.0625, %v789_v12  ;;  %v799_v15 = vadd.f32 %v798_v13, %v797_v10  ;;  %2661 = vmatprep.mubr.msk.f32.mxu0 %vm168_vm0, %v3071_v5  ;;  %v1329_v10 = vld [vmem:[#allocation13 + $0x178] sm:$0xff]  ;;  %v1344_v12 = vld [vmem:[#allocation13 + $0x1f0] sm:$0xff] }
 0x21e   :  { %v1328_v13 = vld [vmem:[#allocation13 + $0x170] sm:$0xff] }
 0x21f   :  { %v800_v16 = vmul.f32 0.0625, %v799_v15  ;;  %v801_v17 = vmul.f32 %v790_v14, %v790_v14  ;;  %v804_v20 = vsub.f32 %v776_v41, %v790_v14  ;;  %v803_v1 = vsub.f32 %v771_v39, %v790_v14  ;;  %v993_v39 = vld [vmem:[#allocation11 + $0x1d8] sm:$0xff]  ;;  %v992_v41 = vld [vmem:[#allocation11 + $0x1d0] sm:$0xff]  ;;  %v1327_v14 = vld [vmem:[#allocation13 + $0x168] sm:$0xff] }
 0x220   :  { %v1342_v15 = vld [vmem:[#allocation13 + $0x1e0] sm:$0xff] }
 0x221   :  { %v802_v18 = vsub.f32 %v800_v16, %v801_v17  ;;  %v812_v22 = vmul.f32 %v2182_v21, %v804_v20  ;;  %v811_v23 = vmul.f32 %v2182_v21, %v803_v1  ;;  %v1341_v16 = vld [vmem:[#allocation13 + $0x1d8] sm:$0xff]  ;;  %v1340_v17 = vld [vmem:[#allocation13 + $0x1d0] sm:$0xff]  ;;  %v1338_v20 = vld [vmem:[#allocation13 + $0x1c0] sm:$0xff] }
 0x222   :  { %v1322_v1 = vld [vmem:[#allocation13 + $0x140] sm:$0xff]  ;;  %v1337_v21 = vld [vmem:[#allocation13 + $0x1b8] sm:$0xff] }
 0x223   :  { %v813_v19 = vadd.f32 1e-05, %v802_v18  ;;  %v1324_v18 = vld [vmem:[#allocation13 + $0x150] sm:$0xff] }
 0x225   :  { %2720 = vrsqrt.f32 %v813_v19  ;;  %v1323_v19 = vld [vmem:[#allocation13 + $0x148] sm:$0xff] }
 0x232   :  { %v2721_v24 = vpop.eup %2720 }
 0x233   :  { %v816_v26 = vmul.f32 %v2721_v24, %v812_v22  ;;  %v815_v27 = vmul.f32 %v2721_v24, %v811_v23  ;;  %v1321_v22 = vld [vmem:[#allocation13 + $0x138] sm:$0xff]  ;;  %v1336_v23 = vld [vmem:[#allocation13 + $0x1b0] sm:$0xff] }
 0x234   :  { %v1320_v24 = vld [vmem:[#allocation13 + $0x130] sm:$0xff] }
 0x235   :  { %v824_v28 = vadd.f32 %v2183_v25, %v816_v26  ;;  %v823_v29 = vadd.f32 %v2183_v25, %v815_v27  ;;  %v1335_v25 = vld [vmem:[#allocation13 + $0x1a8] sm:$0xff]  ;;  %v1334_v27 = vld [vmem:[#allocation13 + $0x1a0] sm:$0xff] }
 0x236   :  { %v1319_v26 = vld [vmem:[#allocation13 + $0x128] sm:$0xff] }
 0x237   :  { %v3142_v30 = vmax.f32 %v824_v28, 0.0  ;;  %v3145_v31 = vmax.f32 %v823_v29, 0.0  ;;  %v1318_v28 = vld [vmem:[#allocation13 + $0x120] sm:$0xff]  ;;  %v1333_v29 = vld [vmem:[#allocation13 + $0x198] sm:$0xff] }
 0x239   :  { %2594 = vmatprep.subr.mxu1 %v3142_v30 }
 0x23a   :  { %2595 = vmatpush3.msra.mxu1 %v3142_v30 }
 0x23b   :  { %2596 = vmatprep.subr.mxu1 %v3145_v31 }
 0x23c   :  { %2597 = vmatpush3.msra.mxu1 %v3145_v31 }
 0x23d   :  { %2599 = vmatmul.mubr.msk.f32.vlgmr.msra.gmra.mxu1 %vm168_vm0, %v3066_v3  ;;  %2601 = vmatprep.subr.mxu1 %v3131_v11  ;;  %v1011_v3 = vld [vmem:[#allocation11 + $0x268] sm:$0xff] }
 0x23e   :  { %2602 = vmatpush3.msra.mxu1 %v3131_v11  ;;  %2605 = vmatprep.mubr.msk.f32.mxu1 %vm168_vm0, %v3071_v5  ;;  %v994_v5 = vld [vmem:[#allocation11 + $0x1e0] sm:$0xff] }
 0x23f   :  { %2603 = vmatprep.subr.mxu1 %v3127_v4 }
 0x240   :  { %2604 = vmatpush3.msra.mxu1 %v3127_v4 }
 0x241   :  { %2606 = vmatmul.mubr.msk.f32.vlgmr.msra.gmra.mxu1 %vm168_vm0, %v3082_v7  ;;  %2334 = vmatprep.subr.mxu1 %v1013_v32  ;;  %v1007_v7 = vld [vmem:[#allocation11 + $0x248] sm:$0xff]  ;;  %v1332_v32 = vld [vmem:[#allocation13 + $0x190] sm:$0xff] }
 0x242   :  { %2335 = vmatpush3.msra.mxu1 %v997_v33  ;;  %v1316_v33 = vld [vmem:[#allocation13 + $0x110] sm:$0xff] }
 0x243   :  { %2336 = vmatprep.subr.mxu1 %v1012_v34  ;;  %v1331_v34 = vld [vmem:[#allocation13 + $0x188] sm:$0xff] }
 0x244   :  { %2337 = vmatpush3.msra.mxu1 %v996_v35  ;;  %v1315_v35 = vld [vmem:[#allocation13 + $0x108] sm:$0xff] }
 0x245   :  { %2338 = vmatprep.subr.mxu1 %v1011_v3  ;;  %v1330_v3 = vld [vmem:[#allocation13 + $0x180] sm:$0xff] }
 0x246   :  { %2339 = vmatpush3.msra.mxu1 %v995_v36  ;;  %v1314_v36 = vld [vmem:[#allocation13 + $0x100] sm:$0xff] }
 0x247   :  { %2340 = vmatprep.subr.mxu1 %v1010_v37 }
 0x248   :  { %2341 = vmatpush3.msra.mxu1 %v994_v5 }
 0x249   :  { %2342 = vmatprep.subr.mxu1 %v1009_v38 }
 0x24a   :  { %2343 = vmatpush3.msra.mxu1 %v993_v39  ;;  %v2189_v39 = vld [vmem:[%s3258_s7 + $0x1] ss:$0 sm:$0xff] }
 0x24b   :  { %2344 = vmatprep.subr.mxu1 %v1008_v40 }
 0x24c   :  { %2345 = vmatpush3.msra.mxu1 %v992_v41 }
 0x24d   :  { %2346 = vmatprep.subr.mxu1 %v1007_v7 }
 0x24e   :  { %2347 = vmatpush3.msra.mxu1 %v991_v42 }
 0x24f   :  { %2348 = vmatprep.subr.mxu1 %v1006_v43 }
 0x250   :  { %2349 = vmatpush3.msra.mxu1 %v990_v0 }
 0x251   :  { %2350 = vmatprep.subr.mxu1 %v1005_v44 }
 0x252   :  { %2351 = vmatpush3.msra.mxu1 %v989_v45 }
 0x253   :  { %2352 = vmatprep.subr.mxu1 %v1004_v46 }
 0x254   :  { %2353 = vmatpush3.msra.mxu1 %v988_v47 }
 0x255   :  { %2354 = vmatprep.subr.mxu1 %v1003_v50 }
 0x256   :  { %2355 = vmatpush3.msra.mxu1 %v987_v51 }
 0x257   :  { %2356 = vmatprep.subr.mxu1 %v1002_v52 }
 0x258   :  { %2357 = vmatpush3.msra.mxu1 %v986_v53 }
 0x259   :  { %2358 = vmatprep.subr.mxu1 %v1001_v54 }
 0x25a   :  { %2359 = vmatpush3.msra.mxu1 %v985_v55  ;;  %v2730_v55 = vld [vmem:[#allocation8] sm:$0xff] }
 0x25b   :  { %2360 = vmatprep.subr.mxu1 %v1000_v56 }
 0x25c   :  { %2361 = vmatpush3.msra.mxu1 %v984_v57 }
 0x25d   :  { %2362 = vmatprep.subr.mxu1 %v999_v58 }
 0x25e   :  { %2363 = vmatpush3.msra.mxu1 %v983_v59 }
 0x25f   :  { %2364 = vmatprep.subr.mxu1 %v998_v60 }
 0x260   :  { %2365 = vmatpush3.msra.mxu1 %v982_v61 }
 0x261   :  { %2643 = vmatprep.subr.mxu1 %v3131_v11 }
 0x2dc   :  { %v2642_v41 = vpop.f32.mrf.mxu0 }
 0x2de   :  { %v1179_v45 = vpop.f32.mrf.mxu0 }
 0x2fd   :  { %v2600_v62 = vpop.f32.mrf.mxu1 }
 0x2ff   :  { %v897_v63 = vpop.f32.mrf.mxu1 }
 0x301   :  { %v2607_v2 = vpop.f32.mrf.mxu1 }
 0x303   :  { %v972_v6 = vpop.f32.mrf.mxu1 }
 0x304   :  { %1102 = vmatprep.mubr.f32.mxu1 %v972_v6 }
 0x305   :  { %1103 = vmatmul.mubr.f32.vlgmr.msra.gmra.mxu1 %v897_v63 }
 0x306   :  { %2644 = vmatpush3.msra.mxu1 %v3131_v11  ;;  %1107 = vmatprep.mubr.f32.mxu1 %v2607_v2  ;;  %v1343_v11 = vld [vmem:[#allocation13 + $0x1e8] sm:$0xff] }
 0x307   :  { %2645 = vmatprep.subr.mxu1 %v3127_v4 }
 0x308   :  { %2646 = vmatpush3.msra.mxu1 %v3127_v4  ;;  %v1326_v4 = vld [vmem:[#allocation13 + $0x160] sm:$0xff] }
 0x309   :  { %1108 = vmatmul.mubr.f32.gmra.mxu1 %v2600_v62  ;;  %2394 = vmatprep.subr.mxu1 %v1345_v8 }
 0x30a   :  { %2647 = vmatprep.mubr.msk.f32.mxu1 %vm168_vm0, %v3089_v48  ;;  %v1325_v48 = vld [vmem:[#allocation13 + $0x158] sm:$0xff] }
 0x30d   :  { %2648 = vmatmul.mubr.msk.f32.vlgmr.msra.gmra.mxu1 %vm168_vm0, %v3096_v49  ;;  %v1339_v49 = vld [vmem:[#allocation13 + $0x1c8] sm:$0xff] }
 0x30e   :  { %1418 = vmatprep.mubr.f32.mxu1 %v3145_v31  ;;  %2395 = vmatpush3.msra.mxu1 %v1329_v10  ;;  %v1317_v31 = vld [vmem:[#allocation13 + $0x118] sm:$0xff] }
 0x30f   :  { %2396 = vmatprep.subr.mxu1 %v1344_v12 }
 0x310   :  { %2397 = vmatpush3.msra.mxu1 %v1328_v13 }
 0x311   :  { %2398 = vmatprep.subr.mxu1 %v1343_v11 }
 0x312   :  { %2399 = vmatpush3.msra.mxu1 %v1327_v14 }
 0x313   :  { %2400 = vmatprep.subr.mxu1 %v1342_v15 }
 0x314   :  { %2401 = vmatpush3.msra.mxu1 %v1326_v4 }
 0x315   :  { %2402 = vmatprep.subr.mxu1 %v1341_v16 }
 0x316   :  { %2403 = vmatpush3.msra.mxu1 %v1325_v48  ;;  %v2192_v48 = vld [vmem:[%s3260_s9 + $0x1] ss:$0 sm:$0xff] }
 0x317   :  { %2404 = vmatprep.subr.mxu1 %v1340_v17 }
 0x318   :  { %2405 = vmatpush3.msra.mxu1 %v1324_v18 }
 0x319   :  { %2406 = vmatprep.subr.mxu1 %v1339_v49 }
 0x31a   :  { %2407 = vmatpush3.msra.mxu1 %v1323_v19  ;;  %v2193_v19 = vld [vmem:[%s3262_s11 + $0x1] ss:$0 sm:$0xff] }
 0x31b   :  { %2408 = vmatprep.subr.mxu1 %v1338_v20 }
 0x31c   :  { %2409 = vmatpush3.msra.mxu1 %v1322_v1 }
 0x31d   :  { %2410 = vmatprep.subr.mxu1 %v1337_v21 }
 0x31e   :  { %2411 = vmatpush3.msra.mxu1 %v1321_v22 }
 0x31f   :  { %2412 = vmatprep.subr.mxu1 %v1336_v23 }
 0x320   :  { %2413 = vmatpush3.msra.mxu1 %v1320_v24 }
 0x321   :  { %2414 = vmatprep.subr.mxu1 %v1335_v25 }
 0x322   :  { %2415 = vmatpush3.msra.mxu1 %v1319_v26  ;;  %v2731_v26 = vld [vmem:[#allocation10 + $0x8] sm:$0xff] }
 0x323   :  { %2416 = vmatprep.subr.mxu1 %v1334_v27  ;;  %v1665_v27 = vld [vmem:[#allocation11 + $0x3f8] sm:$0xff] }
 0x324   :  { %2417 = vmatpush3.msra.mxu1 %v1318_v28  ;;  %v1649_v28 = vld [vmem:[#allocation11 + $0x378] sm:$0xff] }
 0x325   :  { %2418 = vmatprep.subr.mxu1 %v1333_v29  ;;  %v1664_v29 = vld [vmem:[#allocation11 + $0x3f0] sm:$0xff] }
 0x326   :  { %2419 = vmatpush3.msra.mxu1 %v1317_v31  ;;  %v1648_v31 = vld [vmem:[#allocation11 + $0x370] sm:$0xff] }
 0x327   :  { %2420 = vmatprep.subr.mxu1 %v1332_v32  ;;  %v1663_v32 = vld [vmem:[#allocation11 + $0x3e8] sm:$0xff] }
 0x328   :  { %2421 = vmatpush3.msra.mxu1 %v1316_v33  ;;  %v1647_v33 = vld [vmem:[#allocation11 + $0x368] sm:$0xff] }
 0x329   :  { %2422 = vmatprep.subr.mxu1 %v1331_v34  ;;  %v1662_v34 = vld [vmem:[#allocation11 + $0x3e0] sm:$0xff] }
 0x32a   :  { %2423 = vmatpush3.msra.mxu1 %v1315_v35  ;;  %v1646_v35 = vld [vmem:[#allocation11 + $0x360] sm:$0xff] }
 0x32b   :  { %2424 = vmatprep.subr.mxu1 %v1330_v3  ;;  %v1661_v3 = vld [vmem:[#allocation11 + $0x3d8] sm:$0xff] }
 0x32c   :  { %2425 = vmatpush3.msra.mxu1 %v1314_v36  ;;  %v1645_v36 = vld [vmem:[#allocation11 + $0x358] sm:$0xff] }
 0x3c5   :  { %v2366_v37 = vpop.f32.mrf.mxu1 }
 0x3c7   :  { %v2367_v5 = vpop.f32.mrf.mxu1 }
 0x3c8   :  { %v2368_v38 = vadd.f32 %v2367_v5, %v2366_v37  ;;  %v1660_v37 = vld [vmem:[#allocation11 + $0x3d0] sm:$0xff] }
 0x3c9   :  { %v2369_v40 = vpop.f32.mrf.mxu1  ;;  %v1644_v5 = vld [vmem:[#allocation11 + $0x350] sm:$0xff] }
 0x3ca   :  { %v1105_v42 = vadd.f32 %v2368_v38, %v2189_v39  ;;  %v1659_v38 = vld [vmem:[#allocation11 + $0x3c8] sm:$0xff] }
 0x3cb   :  { %v2370_v7 = vpop.f32.mrf.mxu1 }
 0x3cc   :  { %v2371_v43 = vadd.f32 %v2370_v7, %v2369_v40  ;;  %v1180_v47 = vadd.f32 %v1179_v45, %v1105_v42  ;;  %v1658_v40 = vld [vmem:[#allocation11 + $0x3c0] sm:$0xff]  ;;  %v1657_v7 = vld [vmem:[#allocation11 + $0x3b8] sm:$0xff]  ;;  %v1639_v45 = vld [vmem:[#allocation11 + $0x328] sm:$0xff] }
 0x3cd   :  { %v2649_v0 = vpop.f32.mrf.mxu1  ;;  %v1641_v42 = vld [vmem:[#allocation11 + $0x338] sm:$0xff] }
 0x3ce   :  { %v1110_v44 = vadd.f32 %v2371_v43, %v2189_v39  ;;  %v1202_v52 = vmul.f32 %v1180_v47, %v1180_v47  ;;  %v1643_v39 = vld [vmem:[#allocation11 + $0x348] sm:$0xff]  ;;  %v1656_v43 = vld [vmem:[#allocation11 + $0x3b0] sm:$0xff] }
 0x3cf   :  { %v1304_v46 = vpop.f32.mrf.mxu1 }
 0x3d0   :  { %v1185_v50 = vadd.f32 %v2642_v41, %v1110_v44  ;;  %1419 = vmatmul.mubr.f32.vlgmr.msra.gmra.mxu1 %v1304_v46  ;;  %v1642_v41 = vld [vmem:[#allocation11 + $0x340] sm:$0xff]  ;;  %v1655_v44 = vld [vmem:[#allocation11 + $0x3a8] sm:$0xff] }
 0x3d1   :  { %1423 = vmatprep.mubr.f32.mxu1 %v3142_v30  ;;  %v1654_v46 = vld [vmem:[#allocation11 + $0x3a0] sm:$0xff] }
 0x3d2   :  { %v1193_v51 = vmul.f32 %v3113_v9, %v1185_v50 }
 0x3d4   :  { %v1194_v53 = vadd.f32 %v1193_v51, %v1180_v47  ;;  %v1203_v54 = vmul.f32 %v1193_v51, %v1193_v51  ;;  %1424 = vmatmul.mubr.f32.gmra.mxu1 %v2649_v0  ;;  %v1640_v0 = vld [vmem:[#allocation11 + $0x330] sm:$0xff]  ;;  %v1637_v51 = vld [vmem:[#allocation11 + $0x318] sm:$0xff] }
 0x3d5   :  { %2654 = vmatprep.mubr.msk.f32.mxu1 %vm168_vm0, %v2730_v55 }
 0x3d6   :  { %v1195_v56 = vrot.slane %v1194_v53, 4  ;;  %v1204_v57 = vadd.f32 %v1203_v54, %v1202_v52  ;;  %v1652_v52 = vld [vmem:[#allocation11 + $0x390] sm:$0xff]  ;;  %v1651_v54 = vld [vmem:[#allocation11 + $0x388] sm:$0xff] }
 0x3d8   :  { %v1196_v58 = vadd.f32 %v1195_v56, %v1194_v53  ;;  %v1205_v59 = vrot.slane %v1204_v57, 4  ;;  %v1636_v53 = vld [vmem:[#allocation11 + $0x310] sm:$0xff] }
 0x3da   :  { %v1197_v60 = vrot.slane %v1196_v58, 2  ;;  %v1206_v61 = vadd.f32 %v1205_v59, %v1204_v57 }
 0x3dc   :  { %v1198_v62 = vadd.f32 %v1197_v60, %v1196_v58  ;;  %v1207_v63 = vrot.slane %v1206_v61, 2  ;;  %v2197_v58 = vld [vmem:[%s3259_s8 + $0x1] ss:$0 sm:$0xff] }
 0x3de   :  { %v1199_v2 = vrot.slane %v1198_v62, 1  ;;  %v1208_v6 = vadd.f32 %v1207_v63, %v1206_v61 }
 0x3e0   :  { %v1200_v30 = vadd.f32 %v1199_v2, %v1198_v62  ;;  %v1209_v8 = vrot.slane %v1208_v6, 1 }
 0x3e2   :  { %v1201_v10 = vmul.f32 0.083333336, %v1200_v30  ;;  %v1210_v12 = vadd.f32 %v1209_v8, %v1208_v6 }
 0x3e4   :  { %v1211_v13 = vmul.f32 0.083333336, %v1210_v12  ;;  %v1212_v11 = vmul.f32 %v1201_v10, %v1201_v10  ;;  %v1214_v4 = vsub.f32 %v1180_v47, %v1201_v10  ;;  %v1215_v16 = vsub.f32 %v1185_v50, %v1201_v10  ;;  %v1638_v47 = vld [vmem:[#allocation11 + $0x320] sm:$0xff]  ;;  %v1653_v50 = vld [vmem:[#allocation11 + $0x398] sm:$0xff] }
 0x3e6   :  { %v1213_v14 = vsub.f32 %v1211_v13, %v1212_v11  ;;  %v1222_v17 = vmul.f32 %v2192_v48, %v1214_v4  ;;  %v1223_v18 = vmul.f32 %v2192_v48, %v1215_v16 }
 0x3e8   :  { %v1224_v15 = vadd.f32 1e-05, %v1213_v14 }
 0x3ea   :  { %2722 = vrsqrt.f32 %v1224_v15 }
 0x3f7   :  { %v2723_v49 = vpop.eup %2722 }
 0x3f8   :  { %v1226_v20 = vmul.f32 %v2723_v49, %v1222_v17  ;;  %v1227_v1 = vmul.f32 %v2723_v49, %v1223_v18 }
 0x3fa   :  { %v1235_v21 = vadd.f32 %v2193_v19, %v1227_v1  ;;  %v1234_v23 = vadd.f32 %v2193_v19, %v1226_v20 }
 0x3fc   :  { %v1237_v22 = vmul.f32 %v3113_v9, %v1235_v21  ;;  %v3185_v25 = vmax.f32 %v1234_v23, 0.0 }
 0x3fe   :  { %v3182_v24 = vmax.f32 %v1237_v22, 0.0 }
 0x400   :  { %2657 = vmatprep.subr.mxu0 %v3182_v24 }
 0x401   :  { %2658 = vmatpush3.msra.mxu0 %v3182_v24 }
 0x402   :  { %2659 = vmatprep.subr.mxu0 %v3185_v25 }
 0x403   :  { %2660 = vmatpush3.msra.mxu0 %v3185_v25 }
 0x404   :  { %2662 = vmatmul.mubr.msk.f32.vlgmr.msra.gmra.mxu0 %vm168_vm0, %v2731_v26  ;;  %2440 = vmatprep.subr.mxu0 %v1665_v27  ;;  %v2200_v27 = vld [vmem:[%s3261_s10 + $0x1] ss:$0 sm:$0xff] }
 0x405   :  { %2441 = vmatpush3.msra.mxu0 %v1649_v28 }
 0x406   :  { %2442 = vmatprep.subr.mxu0 %v1664_v29 }
 0x407   :  { %2443 = vmatpush3.msra.mxu0 %v1648_v31 }
 0x408   :  { %2444 = vmatprep.subr.mxu0 %v1663_v32  ;;  %v2201_v32 = vld [vmem:[%s3263_s12 + $0x1] ss:$0 sm:$0xff] }
 0x409   :  { %2445 = vmatpush3.msra.mxu0 %v1647_v33 }
 0x40a   :  { %2446 = vmatprep.subr.mxu0 %v1662_v34 }
 0x40b   :  { %2447 = vmatpush3.msra.mxu0 %v1646_v35 }
 0x40c   :  { %2448 = vmatprep.subr.mxu0 %v1661_v3 }
 0x40d   :  { %2449 = vmatpush3.msra.mxu0 %v1645_v36 }
 0x40e   :  { %2450 = vmatprep.subr.mxu0 %v1660_v37 }
 0x40f   :  { %2451 = vmatpush3.msra.mxu0 %v1644_v5  ;;  %v1681_v5 = vld [vmem:[#allocation11 + $0x478] sm:$0xff] }
 0x410   :  { %2452 = vmatprep.subr.mxu0 %v1659_v38  ;;  %v1680_v38 = vld [vmem:[#allocation11 + $0x470] sm:$0xff] }
 0x411   :  { %2453 = vmatpush3.msra.mxu0 %v1643_v39  ;;  %v2732_v39 = vld [vmem:[#allocation8 + $0x8] sm:$0xff] }
 0x412   :  { %2454 = vmatprep.subr.mxu0 %v1658_v40  ;;  %v1679_v40 = vld [vmem:[#allocation11 + $0x468] sm:$0xff] }
 0x413   :  { %2455 = vmatpush3.msra.mxu0 %v1642_v41  ;;  %v1678_v41 = vld [vmem:[#allocation11 + $0x460] sm:$0xff] }
 0x414   :  { %2456 = vmatprep.subr.mxu0 %v1657_v7  ;;  %v1677_v7 = vld [vmem:[#allocation11 + $0x458] sm:$0xff] }
 0x415   :  { %2457 = vmatpush3.msra.mxu0 %v1641_v42  ;;  %v1676_v42 = vld [vmem:[#allocation11 + $0x450] sm:$0xff] }
 0x416   :  { %2458 = vmatprep.subr.mxu0 %v1656_v43  ;;  %v1675_v43 = vld [vmem:[#allocation11 + $0x448] sm:$0xff] }
 0x417   :  { %2459 = vmatpush3.msra.mxu0 %v1640_v0  ;;  %v1674_v0 = vld [vmem:[#allocation11 + $0x440] sm:$0xff] }
 0x418   :  { %2460 = vmatprep.subr.mxu0 %v1655_v44  ;;  %v1673_v44 = vld [vmem:[#allocation11 + $0x438] sm:$0xff] }
 0x419   :  { %2461 = vmatpush3.msra.mxu0 %v1639_v45  ;;  %v1672_v45 = vld [vmem:[#allocation11 + $0x430] sm:$0xff] }
 0x41a   :  { %2462 = vmatprep.subr.mxu0 %v1654_v46  ;;  %v1671_v46 = vld [vmem:[#allocation11 + $0x428] sm:$0xff] }
 0x41b   :  { %2463 = vmatpush3.msra.mxu0 %v1638_v47  ;;  %v1670_v47 = vld [vmem:[#allocation11 + $0x420] sm:$0xff] }
 0x41c   :  { %2464 = vmatprep.subr.mxu0 %v1653_v50  ;;  %v1669_v50 = vld [vmem:[#allocation11 + $0x418] sm:$0xff] }
 0x41d   :  { %2465 = vmatpush3.msra.mxu0 %v1637_v51  ;;  %v1668_v51 = vld [vmem:[#allocation11 + $0x410] sm:$0xff] }
 0x41e   :  { %2466 = vmatprep.subr.mxu0 %v1652_v52  ;;  %v1667_v52 = vld [vmem:[#allocation11 + $0x408] sm:$0xff] }
 0x41f   :  { %2467 = vmatpush3.msra.mxu0 %v1636_v53  ;;  %v1666_v53 = vld [vmem:[#allocation11 + $0x400] sm:$0xff] }
 0x420   :  { %2468 = vmatprep.subr.mxu0 %v1651_v54  ;;  %v2733_v54 = vld [vmem:[#allocation7] sm:$0xff] }
 0x490   :  { %v2426_v55 = vpop.f32.mrf.mxu1 }
 0x492   :  { %v2427_v56 = vpop.f32.mrf.mxu1 }
 0x493   :  { %v2428_v57 = vadd.f32 %v2427_v56, %v2426_v55  ;;  %v2734_v55 = vld [vmem:[#allocation7 + $0x8] sm:$0xff] }
 0x494   :  { %v2429_v59 = vpop.f32.mrf.mxu1 }
 0x495   :  { %v1421_v61 = vadd.f32 %v2428_v57, %v2197_v58  ;;  %v1635_v57 = vld [vmem:[#allocation11 + $0x308] sm:$0xff] }
 0x496   :  { %v2430_v60 = vpop.f32.mrf.mxu1  ;;  %2469 = vmatpush3.msra.mxu0 %v1635_v57 }
 0x497   :  { %v2431_v62 = vadd.f32 %v2430_v60, %v2429_v59  ;;  %v1443_v2 = vmul.f32 %v1421_v61, %v1421_v61  ;;  %v1650_v59 = vld [vmem:[#allocation11 + $0x380] sm:$0xff] }
 0x498   :  { %2470 = vmatprep.subr.mxu0 %v1650_v59  ;;  %v1634_v60 = vld [vmem:[#allocation11 + $0x300] sm:$0xff] }
 0x499   :  { %v1426_v63 = vadd.f32 %v2431_v62, %v2197_v58  ;;  %2471 = vmatpush3.msra.mxu0 %v1634_v60  ;;  %v1981_v62 = vld [vmem:[#allocation13 + $0x278] sm:$0xff] }
 0x49b   :  { %v1435_v6 = vadd.f32 %v1426_v63, %v1421_v61  ;;  %v1444_v30 = vmul.f32 %v1426_v63, %v1426_v63 }
 0x49d   :  { %v1436_v8 = vrot.slane %v1435_v6, 4  ;;  %v1445_v10 = vadd.f32 %v1444_v30, %v1443_v2  ;;  %v1996_v2 = vld [vmem:[#allocation13 + $0x2f0] sm:$0xff]  ;;  %v1979_v30 = vld [vmem:[#allocation13 + $0x268] sm:$0xff] }
 0x49f   :  { %v1437_v12 = vadd.f32 %v1436_v8, %v1435_v6  ;;  %v1446_v13 = vrot.slane %v1445_v10, 4  ;;  %v1995_v6 = vld [vmem:[#allocation13 + $0x2e8] sm:$0xff]  ;;  %v1994_v8 = vld [vmem:[#allocation13 + $0x2e0] sm:$0xff] }
 0x4a1   :  { %v1438_v11 = vrot.slane %v1437_v12, 2  ;;  %v1447_v14 = vadd.f32 %v1446_v13, %v1445_v10  ;;  %v1978_v10 = vld [vmem:[#allocation13 + $0x260] sm:$0xff]  ;;  %v1977_v13 = vld [vmem:[#allocation13 + $0x258] sm:$0xff] }
 0x4a3   :  { %v1439_v15 = vadd.f32 %v1438_v11, %v1437_v12  ;;  %v1448_v4 = vrot.slane %v1447_v14, 2  ;;  %v1993_v12 = vld [vmem:[#allocation13 + $0x2d8] sm:$0xff]  ;;  %v1992_v11 = vld [vmem:[#allocation13 + $0x2d0] sm:$0xff] }
 0x4a5   :  { %v1440_v16 = vrot.slane %v1439_v15, 1  ;;  %v1449_v48 = vadd.f32 %v1448_v4, %v1447_v14  ;;  %v1976_v14 = vld [vmem:[#allocation13 + $0x250] sm:$0xff]  ;;  %v1975_v4 = vld [vmem:[#allocation13 + $0x248] sm:$0xff] }
 0x4a7   :  { %v1441_v17 = vadd.f32 %v1440_v16, %v1439_v15  ;;  %v1450_v18 = vrot.slane %v1449_v48, 1  ;;  %v1991_v15 = vld [vmem:[#allocation13 + $0x2c8] sm:$0xff]  ;;  %v1990_v16 = vld [vmem:[#allocation13 + $0x2c0] sm:$0xff] }
 0x4a9   :  { %v1442_v49 = vmul.f32 0.0625, %v1441_v17  ;;  %v1451_v19 = vadd.f32 %v1450_v18, %v1449_v48  ;;  %v1974_v48 = vld [vmem:[#allocation13 + $0x240] sm:$0xff]  ;;  %v1989_v17 = vld [vmem:[#allocation13 + $0x2b8] sm:$0xff] }
 0x4aa   :  { %v1973_v18 = vld [vmem:[#allocation13 + $0x238] sm:$0xff] }
 0x4ab   :  { %v1452_v20 = vmul.f32 0.0625, %v1451_v19  ;;  %v1453_v1 = vmul.f32 %v1442_v49, %v1442_v49  ;;  %v1456_v23 = vsub.f32 %v1426_v63, %v1442_v49  ;;  %v1455_v26 = vsub.f32 %v1421_v61, %v1442_v49  ;;  %v1988_v49 = vld [vmem:[#allocation13 + $0x2b0] sm:$0xff] }
 0x4ac   :  { %v1972_v19 = vld [vmem:[#allocation13 + $0x230] sm:$0xff] }
 0x4ad   :  { %v1454_v21 = vsub.f32 %v1452_v20, %v1453_v1  ;;  %v1464_v28 = vmul.f32 %v2200_v27, %v1456_v23  ;;  %v1463_v29 = vmul.f32 %v2200_v27, %v1455_v26  ;;  %v1987_v20 = vld [vmem:[#allocation13 + $0x2a8] sm:$0xff]  ;;  %v1985_v23 = vld [vmem:[#allocation13 + $0x298] sm:$0xff]  ;;  %v1984_v27 = vld [vmem:[#allocation13 + $0x290] sm:$0xff] }
 0x4ae   :  { %v1971_v1 = vld [vmem:[#allocation13 + $0x228] sm:$0xff]  ;;  %v1969_v26 = vld [vmem:[#allocation13 + $0x218] sm:$0xff] }
 0x4af   :  { %v1465_v22 = vadd.f32 1e-05, %v1454_v21  ;;  %v1986_v21 = vld [vmem:[#allocation13 + $0x2a0] sm:$0xff] }
 0x4b1   :  { %2724 = vrsqrt.f32 %v1465_v22  ;;  %v1970_v22 = vld [vmem:[#allocation13 + $0x220] sm:$0xff] }
 0x4be   :  { %v2725_v31 = vpop.eup %2724 }
 0x4bf   :  { %v1468_v33 = vmul.f32 %v2725_v31, %v1464_v28  ;;  %v1467_v34 = vmul.f32 %v2725_v31, %v1463_v29  ;;  %v1968_v28 = vld [vmem:[#allocation13 + $0x210] sm:$0xff]  ;;  %v1983_v29 = vld [vmem:[#allocation13 + $0x288] sm:$0xff] }
 0x4c0   :  { %v1967_v31 = vld [vmem:[#allocation13 + $0x208] sm:$0xff] }
 0x4c1   :  { %v1476_v35 = vadd.f32 %v2201_v32, %v1468_v33  ;;  %v1475_v3 = vadd.f32 %v2201_v32, %v1467_v34  ;;  %v1982_v32 = vld [vmem:[#allocation13 + $0x280] sm:$0xff] }
 0x4c2   :  { %v1966_v33 = vld [vmem:[#allocation13 + $0x200] sm:$0xff] }
 0x4c3   :  { %v3200_v36 = vmax.f32 %v1476_v35, 0.0  ;;  %v3203_v37 = vmax.f32 %v1475_v3, 0.0 }
 0x4c4   :  { %v2663_v56 = vpop.f32.mrf.mxu0 }
 0x4c5   :  { %2650 = vmatprep.subr.mxu1 %v3200_v36 }
 0x4c6   :  { %2651 = vmatpush3.msra.mxu1 %v3200_v36  ;;  %v1624_v58 = vpop.f32.mrf.mxu0 }
 0x4c7   :  { %2652 = vmatprep.subr.mxu1 %v3203_v37  ;;  %1754 = vmatprep.mubr.f32.mxu0 %v1624_v58 }
 0x4c8   :  { %2653 = vmatpush3.msra.mxu1 %v3203_v37 }
 0x4c9   :  { %2655 = vmatmul.mubr.msk.f32.vlgmr.msra.gmra.mxu1 %vm168_vm0, %v2732_v39  ;;  %2664 = vmatprep.subr.mxu1 %v1681_v5 }
 0x4ca   :  { %2665 = vmatpush3.msra.mxu1 %v1681_v5  ;;  %2696 = vmatprep.mubr.f32.mxu1 %v3185_v25 }
 0x4cb   :  { %2666 = vmatprep.subr.mxu1 %v1680_v38 }
 0x4cc   :  { %2667 = vmatpush3.msra.mxu1 %v1680_v38 }
 0x4cd   :  { %2668 = vmatprep.subr.mxu1 %v1679_v40 }
 0x4ce   :  { %2669 = vmatpush3.msra.mxu1 %v1679_v40  ;;  %v2207_v40 = vld [vmem:[%s3258_s7 + $0x2] ss:$0 sm:$0xff] }
 0x4cf   :  { %2670 = vmatprep.subr.mxu1 %v1678_v41 }
 0x4d0   :  { %2671 = vmatpush3.msra.mxu1 %v1678_v41 }
 0x4d1   :  { %2672 = vmatprep.subr.mxu1 %v1677_v7 }
 0x4d2   :  { %2673 = vmatpush3.msra.mxu1 %v1677_v7 }
 0x4d3   :  { %2674 = vmatprep.subr.mxu1 %v1676_v42 }
 0x4d4   :  { %2675 = vmatpush3.msra.mxu1 %v1676_v42 }
 0x4d5   :  { %2676 = vmatprep.subr.mxu1 %v1675_v43 }
 0x4d6   :  { %2677 = vmatpush3.msra.mxu1 %v1675_v43 }
 0x4d7   :  { %2678 = vmatprep.subr.mxu1 %v1674_v0 }
 0x4d8   :  { %2679 = vmatpush3.msra.mxu1 %v1674_v0 }
 0x4d9   :  { %2680 = vmatprep.subr.mxu1 %v1673_v44 }
 0x4da   :  { %2681 = vmatpush3.msra.mxu1 %v1673_v44 }
 0x4db   :  { %2682 = vmatprep.subr.mxu1 %v1672_v45 }
 0x4dc   :  { %2683 = vmatpush3.msra.mxu1 %v1672_v45 }
 0x4dd   :  { %2684 = vmatprep.subr.mxu1 %v1671_v46 }
 0x4de   :  { %2685 = vmatpush3.msra.mxu1 %v1671_v46 }
 0x4df   :  { %2686 = vmatprep.subr.mxu1 %v1670_v47 }
 0x4e0   :  { %2687 = vmatpush3.msra.mxu1 %v1670_v47 }
 0x4e1   :  { %2688 = vmatprep.subr.mxu1 %v1669_v50 }
 0x4e2   :  { %2689 = vmatpush3.msra.mxu1 %v1669_v50 }
 0x4e3   :  { %2690 = vmatprep.subr.mxu1 %v1668_v51 }
 0x4e4   :  { %2691 = vmatpush3.msra.mxu1 %v1668_v51 }
 0x4e5   :  { %2692 = vmatprep.subr.mxu1 %v1667_v52 }
 0x4e6   :  { %2693 = vmatpush3.msra.mxu1 %v1667_v52 }
 0x4e7   :  { %2694 = vmatprep.subr.mxu1 %v1666_v53 }
 0x4e8   :  { %2695 = vmatpush3.msra.mxu1 %v1666_v53 }
 0x4e9   :  { %2697 = vmatmul.mubr.f32.vlgmr.msra.gmra.mxu1 %v3182_v24  ;;  %2699 = vmatprep.subr.mxu1 %v3182_v24 }
 0x4ea   :  { %2700 = vmatpush3.msra.mxu1 %v3182_v24  ;;  %2703 = vmatprep.mubr.msk.f32.mxu1 %vm168_vm0, %v2733_v54  ;;  %v1997_v24 = vld [vmem:[#allocation13 + $0x2f8] sm:$0xff] }
 0x4eb   :  { %2701 = vmatprep.subr.mxu1 %v3185_v25  ;;  %2500 = vmatprep.subr.mxu0 %v1997_v24 }
 0x4ec   :  { %2702 = vmatpush3.msra.mxu1 %v3185_v25  ;;  %v1980_v25 = vld [vmem:[#allocation13 + $0x270] sm:$0xff] }
 0x4ed   :  { %2704 = vmatmul.mubr.msk.f32.vlgmr.msra.gmra.mxu1 %vm168_vm0, %v2734_v55 }
 0x589   :  { %v2656_v61 = vpop.f32.mrf.mxu1 }
 0x58b   :  { %v1549_v63 = vpop.f32.mrf.mxu1 }
 0x58c   :  { %1755 = vmatmul.mubr.f32.vlgmr.msra.gmra.mxu0 %v1549_v63 }
 0x58d   :  { %1759 = vmatprep.mubr.f32.mxu0 %v2663_v56  ;;  %2501 = vmatpush3.msra.mxu0 %v1981_v62 }
 0x58e   :  { %2502 = vmatprep.subr.mxu0 %v1996_v2 }
 0x58f   :  { %2503 = vmatpush3.msra.mxu0 %v1980_v25 }
 0x590   :  { %1760 = vmatmul.mubr.f32.gmra.mxu0 %v2656_v61  ;;  %2504 = vmatprep.subr.mxu0 %v1995_v6 }
 0x591   :  { %2070 = vmatprep.mubr.f32.mxu0 %v3203_v37  ;;  %2505 = vmatpush3.msra.mxu0 %v1979_v30 }
 0x592   :  { %2506 = vmatprep.subr.mxu0 %v1994_v8 }
 0x593   :  { %2507 = vmatpush3.msra.mxu0 %v1978_v10 }
 0x594   :  { %2508 = vmatprep.subr.mxu0 %v1993_v12 }
 0x595   :  { %2509 = vmatpush3.msra.mxu0 %v1977_v13  ;;  %v2215_v13 = vld [vmem:[%s3259_s8 + $0x2] ss:$0 sm:$0xff] }
 0x596   :  { %2510 = vmatprep.subr.mxu0 %v1992_v11 }
 0x597   :  { %2511 = vmatpush3.msra.mxu0 %v1976_v14 }
 0x598   :  { %2512 = vmatprep.subr.mxu0 %v1991_v15 }
 0x599   :  { %2513 = vmatpush3.msra.mxu0 %v1975_v4 }
 0x59a   :  { %2514 = vmatprep.subr.mxu0 %v1990_v16 }
 0x59b   :  { %2515 = vmatpush3.msra.mxu0 %v1974_v48 }
 0x59c   :  { %2516 = vmatprep.subr.mxu0 %v1989_v17 }
 0x59d   :  { %2517 = vmatpush3.msra.mxu0 %v1973_v18  ;;  %v2210_v18 = vld [vmem:[%s3260_s9 + $0x2] ss:$0 sm:$0xff]  ;;  %s2875_s9 = scalar_lea.vmem %s2141_s5, 256 }
 0x59e   :  { %2518 = vmatprep.subr.mxu0 %v1988_v49  ;;  %p2876_p7 = scmp.ne.s32.totalorder %s2141_s5, %s2875_s9  ;;  %p2881_p9 = scmp.lt.s32.totalorder %s2875_s9, %s2875_s9 }
 0x59f   :  { %2519 = vmatpush3.msra.mxu0 %v1972_v19 }
 0x5a0   :  { %2520 = vmatprep.subr.mxu0 %v1987_v20  ;;  %p2882_p10 = por %p2881_p9, %p2880_p8 }
 0x5a1   :  { %2521 = vmatpush3.msra.mxu0 %v1971_v1 }
 0x5a2   :  { %2522 = vmatprep.subr.mxu0 %v1986_v21  ;;  %p2883_p11 = pnand %p2882_p10, %p2876_p7 }
 0x5a3   :  { %2523 = vmatpush3.msra.mxu0 %v1970_v22 }
 0x5a4   :  { %2524 = vmatprep.subr.mxu0 %v1985_v23 }
 0x5a5   :  { %2525 = vmatpush3.msra.mxu0 %v1969_v26 }
 0x5a6   :  { %2526 = vmatprep.subr.mxu0 %v1984_v27  ;;  %v2211_v27 = vld [vmem:[%s3262_s11 + $0x2] ss:$0 sm:$0xff] }
 0x5a7   :  { %2527 = vmatpush3.msra.mxu0 %v1968_v28 }
 0x5a8   :  { %2528 = vmatprep.subr.mxu0 %v1983_v29 }
 0x5a9   :  { %v2698_v34 = vpop.f32.mrf.mxu1  ;;  %2529 = vmatpush3.msra.mxu0 %v1967_v31 }
 0x5aa   :  { %2530 = vmatprep.subr.mxu0 %v1982_v32 }
 0x5ab   :  { %v1831_v35 = vpop.f32.mrf.mxu1  ;;  %2531 = vmatpush3.msra.mxu0 %v1966_v33 }
 0x5ad   :  { %v2705_v3 = vpop.f32.mrf.mxu1 }
 0x5af   :  { %v1956_v37 = vpop.f32.mrf.mxu1 }
 0x5b0   :  { %2071 = vmatmul.mubr.f32.vlgmr.msra.gmra.mxu0 %v1956_v37 }
 0x5b1   :  { %2075 = vmatprep.mubr.f32.mxu0 %v3200_v36 }
 0x5b4   :  { %2076 = vmatmul.mubr.f32.gmra.mxu0 %v2705_v3 }
 0x64c   :  { %v2472_v5 = vpop.f32.mrf.mxu0 }
 0x64e   :  { %v2473_v38 = vpop.f32.mrf.mxu0 }
 0x64f   :  { %v2474_v39 = vadd.f32 %v2473_v38, %v2472_v5 }
 0x650   :  { %v2475_v41 = vpop.f32.mrf.mxu0 }
 0x651   :  { %v1757_v42 = vadd.f32 %v2474_v39, %v2207_v40 }
 0x652   :  { %v2476_v7 = vpop.f32.mrf.mxu0 }
 0x653   :  { %v2477_v43 = vadd.f32 %v2476_v7, %v2475_v41  ;;  %v1832_v44 = vadd.f32 %v1831_v35, %v1757_v42 }
 0x655   :  { %v1762_v0 = vadd.f32 %v2477_v43, %v2207_v40  ;;  %v1854_v47 = vmul.f32 %v1832_v44, %v1832_v44 }
 0x657   :  { %v1837_v45 = vadd.f32 %v2698_v34, %v1762_v0 }
 0x659   :  { %v1845_v46 = vmul.f32 %v3113_v9, %v1837_v45 }
 0x65b   :  { %v1846_v50 = vadd.f32 %v1845_v46, %v1832_v44  ;;  %v1855_v36 = vmul.f32 %v1845_v46, %v1845_v46 }
 0x65d   :  { %v1847_v51 = vrot.slane %v1846_v50, 4  ;;  %v1856_v52 = vadd.f32 %v1855_v36, %v1854_v47 }
 0x65f   :  { %v1848_v53 = vadd.f32 %v1847_v51, %v1846_v50  ;;  %v1857_v54 = vrot.slane %v1856_v52, 4 }
 0x661   :  { %v1849_v55 = vrot.slane %v1848_v53, 2  ;;  %v1858_v56 = vadd.f32 %v1857_v54, %v1856_v52 }
 0x663   :  { %v1850_v57 = vadd.f32 %v1849_v55, %v1848_v53  ;;  %v1859_v58 = vrot.slane %v1858_v56, 2 }
 0x665   :  { %v1851_v59 = vrot.slane %v1850_v57, 1  ;;  %v1860_v60 = vadd.f32 %v1859_v58, %v1858_v56 }
 0x667   :  { %v1852_v24 = vadd.f32 %v1851_v59, %v1850_v57  ;;  %v1861_v61 = vrot.slane %v1860_v60, 1 }
 0x669   :  { %v1853_v62 = vmul.f32 0.083333336, %v1852_v24  ;;  %v1862_v63 = vadd.f32 %v1861_v61, %v1860_v60 }
 0x66b   :  { %v1863_v2 = vmul.f32 0.083333336, %v1862_v63  ;;  %v1864_v25 = vmul.f32 %v1853_v62, %v1853_v62  ;;  %v1867_v16 = vsub.f32 %v1837_v45, %v1853_v62  ;;  %v1866_v17 = vsub.f32 %v1832_v44, %v1853_v62 }
 0x66d   :  { %v1865_v6 = vsub.f32 %v1863_v2, %v1864_v25  ;;  %v1875_v1 = vmul.f32 %v2210_v18, %v1867_v16  ;;  %v1874_v23 = vmul.f32 %v2210_v18, %v1866_v17 }
 0x66f   :  { %v1876_v30 = vadd.f32 1e-05, %v1865_v6 }
 0x670   :  { %v2532_v8 = vpop.f32.mrf.mxu0 }
 0x671   :  { %2726 = vrsqrt.f32 %v1876_v30 }
 0x672   :  { %v2533_v10 = vpop.f32.mrf.mxu0 }
 0x673   :  { %v2534_v12 = vadd.f32 %v2533_v10, %v2532_v8 }
 0x674   :  { %v2535_v11 = vpop.f32.mrf.mxu0 }
 0x675   :  { %v2073_v15 = vadd.f32 %v2534_v12, %v2215_v13 }
 0x676   :  { %v2536_v14 = vpop.f32.mrf.mxu0 }
 0x677   :  { %v2537_v4 = vadd.f32 %v2536_v14, %v2535_v11  ;;  %v2095_v49 = vmul.f32 %v2073_v15, %v2073_v15 }
 0x679   :  { %v2078_v48 = vadd.f32 %v2537_v4, %v2215_v13 }
 0x67b   :  { %v2087_v19 = vadd.f32 %v2078_v48, %v2073_v15  ;;  %v2096_v20 = vmul.f32 %v2078_v48, %v2078_v48 }
 0x67d   :  { %v2088_v21 = vrot.slane %v2087_v19, 4  ;;  %v2097_v22 = vadd.f32 %v2096_v20, %v2095_v49 }
 0x67e   :  { %v2727_v26 = vpop.eup %2726 }
 0x67f   :  { %v2089_v28 = vadd.f32 %v2088_v21, %v2087_v19  ;;  %v2098_v29 = vrot.slane %v2097_v22, 4  ;;  %v1878_v31 = vmul.f32 %v2727_v26, %v1874_v23  ;;  %v1879_v32 = vmul.f32 %v2727_v26, %v1875_v1 }
 0x681   :  { %v2090_v33 = vrot.slane %v2089_v28, 2  ;;  %v2099_v34 = vadd.f32 %v2098_v29, %v2097_v22  ;;  %v1886_v35 = vadd.f32 %v2211_v27, %v1878_v31  ;;  %v1887_v3 = vadd.f32 %v2211_v27, %v1879_v32 }
 0x683   :  { %v2091_v37 = vadd.f32 %v2090_v33, %v2089_v28  ;;  %v2100_v5 = vrot.slane %v2099_v34, 2  ;;  %v1889_v38 = vmul.f32 %v3113_v9, %v1887_v3  ;;  %2131 = vst [vmem:[#allocation14] sm:$0xff] %v1886_v35 }
 0x685   :  { %v2092_v39 = vrot.slane %v2091_v37, 1  ;;  %v2101_v40 = vadd.f32 %v2100_v5, %v2099_v34  ;;  %2132 = vst [vmem:[#allocation14 + $0x8] sm:$0xff] %v1889_v38 }
 0x686   :  { %2886 = shalt.err (!%p2883_p11)
}
 0x687   :  { %2146 = dma.vmem_to_hbm [thread:$0]  %s2141_s5, 256, %s3264_s13, [#allocation4], %s2929_s18, %s2929_s18, %s2930_s19   ;;  %v2093_v9 = vadd.f32 %v2092_v39, %v2091_v37  ;;  %v2102_v41 = vrot.slane %v2101_v40, 1 }
 0x688   :  { %v2218_v50 = vld [vmem:[%s3261_s10 + $0x2] ss:$0 sm:$0xff]  ;;  %s2938_s26 = smov [#allocation15]  }
 0x689   :  { %v2094_v7 = vmul.f32 0.0625, %v2093_v9  ;;  %v2103_v42 = vadd.f32 %v2102_v41, %v2101_v40  ;;  %v2219_v53 = vld [vmem:[%s3263_s12 + $0x2] ss:$0 sm:$0xff]  ;;  %s2152_s27 = sshll.u32 %s2938_s26, 4  ;;  %s2153_s27 = int_to_ptr.vmem [resolvable:$true] %s2152_s27 }
 0x68a   :  { %s2895_s28 = scalar_lea.vmem %s2153_s27, 256  ;;  %p2900_p13 = scmp.lt.s32.totalorder %s2153_s27, %s2153_s27 }
 0x68b   :  { %v2104_v43 = vmul.f32 0.0625, %v2103_v42  ;;  %v2105_v0 = vmul.f32 %v2094_v7, %v2094_v7  ;;  %v2108_v46 = vsub.f32 %v2078_v48, %v2094_v7  ;;  %v2107_v47 = vsub.f32 %v2073_v15, %v2094_v7  ;;  %p2896_p12 = scmp.ne.s32.totalorder %s2153_s27, %s2895_s28  ;;  %p2901_p0 = scmp.lt.s32.totalorder %s2895_s28, %s2895_s28 }
 0x68d   :  { %v2106_v44 = vsub.f32 %v2104_v43, %v2105_v0  ;;  %v2116_v36 = vmul.f32 %v2218_v50, %v2108_v46  ;;  %v2115_v51 = vmul.f32 %v2218_v50, %v2107_v47  ;;  %p2902_p1 = por %p2901_p0, %p2900_p13 }
 0x68f   :  { %v2117_v45 = vadd.f32 1e-05, %v2106_v44  ;;  %p2903_p2 = pnand %p2902_p1, %p2896_p12 }
 0x691   :  { %2728 = vrsqrt.f32 %v2117_v45 }
 0x69e   :  { %v2729_v52 = vpop.eup %2728 }
 0x69f   :  { %v2119_v54 = vmul.f32 %v2729_v52, %v2115_v51  ;;  %v2120_v55 = vmul.f32 %v2729_v52, %v2116_v36 }
 0x6a1   :  { %v2127_v56 = vadd.f32 %v2219_v53, %v2119_v54  ;;  %v2128_v57 = vadd.f32 %v2219_v53, %v2120_v55 }
 0x6a3   :  { %2133 = vst [vmem:[#allocation15] sm:$0xff] %v2127_v56  ;;  %2134 = vst [vmem:[#allocation15 + $0x8] sm:$0xff] %v2128_v57 }
 0x6a4   :  { %2906 = shalt.err (!%p2903_p2)
}
 0x6a5   :  { %2158 = dma.vmem_to_hbm [thread:$0]  %s2153_s27, 256, %s3265_s14, [#allocation16], %s2929_s18, %s2929_s18, %s2930_s19  }
 0x6a6   :  { %2923 = dma.done.wait [#allocation4], 256  }
 0x6a7   :  { %2924 = vsyncadd [#allocation4], 4294967040 }
 0x6a8   :  { %2925 = dma.done.wait [#allocation16], 256  }
 0x6a9   :  { %2926 = vsyncadd [#allocation16], 4294967040 }
 0x6aa   :  { %2165 = vsyncpa [#allocation3], 1 }
 0x6ab   :  { %2166 = vsyncpa [#allocation6], 1 }
 0x6ac   :  { %2167 = vsyncpa [#allocation9], 1 }
 0x6ad   :  { %2168 = vsyncpa [#allocation12], 1 }
 0x6ae   :  { %2169 = vsyncpa [#allocation4], 1 }
 0x6af   :  { %2170 = vsyncpa [#allocation16], 1 }

</bundles_post_ra>
